<compile_context>
chip_gen: v6e
topology: v6e:2x2x1
jax: 0.10.0
libtpu: 0.0.40
codegen_flags: <defaults>
</compile_context>

<pallas_src>
import functools

import jax
import jax.numpy as jnp
import numpy as np
from jax.experimental import pallas as pl
from jax.experimental.pallas import tpu as pltpu

SUBLANE = 8
LANE = 128


# -----------------------------------------------------------------------------
# Fused CharRNN forward kernel.
# refs = [x, h0, c0, (w_ih_t, w_hh_t, b) * L, fc_w_t, fc_b,      <- inputs
#         out, hn, cn,                                           <- outputs
#         y_s, gx_s]                                             <- VMEM scratch
# Gate column order inside the kernel is [i, f, o, g] (pre-permuted in the wrapper).
# -----------------------------------------------------------------------------
def _char_rnn_kernel(*refs, n_layers, hidden, seq_len, batch_pad):
    H, T, B = hidden, seq_len, batch_pad

    x_ref, h0_ref, c0_ref = refs[:3]
    layer_refs = refs[3:3 + 3 * n_layers]
    fc_w_ref = refs[3 + 3 * n_layers]
    fc_b_ref = refs[4 + 3 * n_layers]
    out_ref, hn_ref, cn_ref = refs[5 + 3 * n_layers:8 + 3 * n_layers]
    y_s = refs[8 + 3 * n_layers]       # (T*B, H)  bf16: current layer output sequence
    gx_s = refs[9 + 3 * n_layers]      # (T*B, 4H) f32 : hoisted input projection

    for l in range(n_layers):
        w_ih = layer_refs[3 * l][...]      # (in, 4H) bf16
        w_hh = layer_refs[3 * l + 1][...]  # (H, 4H)  bf16
        bias = layer_refs[3 * l + 2][...]  # (1, 4H)  f32

        # Layer input: raw x (bf16) for layer 0, previous layer's hidden sequence after.
        inp = x_ref[...] if l == 0 else y_s[...]          # (T*B, in) bf16

        # Hoisted input projection: one big MXU matmul per layer, f32 accumulation,
        # materialized into a reused VMEM scratch (bounds VMEM deterministically).
        gx_s[...] = jnp.dot(inp, w_ih, preferred_element_type=jnp.float32) + bias

        h = h0_ref[l]                                      # (B, H) f32
        c = c0_ref[l]                                      # (B, H) f32

        # Serial recurrence, fully unrolled (T small & static); all row offsets are
        # static multiples of the padded batch (multiple of 8 sublanes).
        for t in range(T):
            row = t * B
            gates = gx_s[row:row + B, :] + jnp.dot(
                h.astype(w_hh.dtype), w_hh,
                preferred_element_type=jnp.float32)        # (B, 4H) f32

            # One sigmoid (via tanh on the EUP) over [i|f|o], one tanh over g.
            sig = 0.5 * jnp.tanh(0.5 * gates[:, :3 * H]) + 0.5
            g_g = jnp.tanh(gates[:, 3 * H:])
            i_g = sig[:, 0 * H:1 * H]
            f_g = sig[:, 1 * H:2 * H]
            o_g = sig[:, 2 * H:3 * H]

            c = f_g * c + i_g * g_g
            h = o_g * jnp.tanh(c)
            y_s[row:row + B, :] = h.astype(y_s.dtype)

        # Final states written exactly once per layer.
        hn_ref[l] = h.astype(hn_ref.dtype)
        cn_ref[l] = c.astype(cn_ref.dtype)
        # Inter-layer dropout: identity (eval mode).

    # Dropout before FC: identity (eval mode).
    # FC epilogue fused into the same kernel, lane-dense (V padded to 128) output.
    out_ref[...] = (jnp.dot(y_s[...], fc_w_ref[...],
                            preferred_element_type=jnp.float32)
                    + fc_b_ref[...]).astype(out_ref.dtype)


def _full_spec(shape):
    zeros = (0,) * len(shape)
    return pl.BlockSpec(shape, lambda i, _z=zeros: _z)


def _nbytes(shape, dtype):
    return int(np.prod(shape)) * jnp.dtype(dtype).itemsize


# -----------------------------------------------------------------------------
# CharRNN forward (eval mode): multi-layer LSTM -> dropout(identity) -> fc
# -----------------------------------------------------------------------------
def char_rnn_forward(x, hidden, params):
    """x: (B, T, vocab) batch_first. hidden: (h0, c0) each (L, B, H)."""
    h0_all, c0_all = hidden
    L, B, H = h0_all.shape
    _, T, V_in = x.shape
    fc_w_t = params["fc"]["w_t"]          # (H, V_out)
    fc_b = params["fc"]["b"]              # (1, V_out)
    V_out = fc_w_t.shape[-1]

    for l in range(1, L):
        assert params["lstm"][l]["w_ih_t"].shape[0] == H, \
            "layer-l>0 input width must equal n_hidden"

    B_pad = ((B + SUBLANE - 1) // SUBLANE) * SUBLANE       # full sublane tiles
    V_pad = ((V_out + LANE - 1) // LANE) * LANE            # lane-dense FC output

    # Pad batch rows with zeros (garbage rows computed and discarded).
    if B_pad != B:
        x = jnp.pad(x, ((0, B_pad - B), (0, 0), (0, 0)))
        h0_all = jnp.pad(h0_all, ((0, 0), (0, B_pad - B), (0, 0)))
        c0_all = jnp.pad(c0_all, ((0, 0), (0, B_pad - B), (0, 0)))

    # Time-major flat rows (t*B_pad + b), bf16 matmul inputs; layout plumbing in XLA.
    x_tm = jnp.transpose(x, (1, 0, 2)).reshape(T * B_pad, V_in).astype(jnp.bfloat16)

    # Gate-column permutation [i,f,g,o] -> [i,f,o,g] (applies to the 4H axis).
    def reorder(w):
        return jnp.concatenate(
            [w[..., :2 * H], w[..., 3 * H:4 * H], w[..., 2 * H:3 * H]], axis=-1)

    args = [x_tm, h0_all.astype(jnp.float32), c0_all.astype(jnp.float32)]
    in_specs = [_full_spec(a.shape) for a in args]
    for p in params["lstm"]:
        w_ih = reorder(p["w_ih_t"]).astype(jnp.bfloat16)   # (in, 4H)
        w_hh = reorder(p["w_hh_t"]).astype(jnp.bfloat16)   # (H, 4H)
        b = reorder(p["b"]).astype(jnp.float32)            # (1, 4H)
        for a in (w_ih, w_hh, b):
            args.append(a)
            in_specs.append(_full_spec(a.shape))

    fc_w_p = jnp.pad(fc_w_t, ((0, 0), (0, V_pad - V_out))).astype(jnp.bfloat16)
    fc_b_p = jnp.pad(fc_b, ((0, 0), (0, V_pad - V_out))).astype(jnp.float32)
    args += [fc_w_p, fc_b_p]
    in_specs += [_full_spec(fc_w_p.shape), _full_spec(fc_b_p.shape)]

    out_shape = (
        jax.ShapeDtypeStruct((T * B_pad, V_pad), jnp.float32),  # logits (lane-dense)
        jax.ShapeDtypeStruct((L, B_pad, H), jnp.float32),        # h_n
        jax.ShapeDtypeStruct((L, B_pad, H), jnp.float32),        # c_n
    )
    out_specs = [_full_spec(s.shape) for s in out_shape]

    scratch_shapes = [
        pltpu.VMEM((T * B_pad, H), jnp.bfloat16),        # layer output sequence y_s
        pltpu.VMEM((T * B_pad, 4 * H), jnp.float32),     # hoisted projection gx_s
    ]

    # Explicit VMEM budget: resident inputs/outputs (x2 for double buffering) + scratch
    # + headroom, clamped to stay under the physical budget on all generations.
    resident = sum(_nbytes(a.shape, a.dtype) for a in args)
    resident += sum(_nbytes(s.shape, s.dtype) for s in out_shape)
    scratch = _nbytes((T * B_pad, H), jnp.bfloat16) + _nbytes((T * B_pad, 4 * H),
                                                              jnp.float32)
    vmem_limit = int(max(32 << 20, min(100 << 20, 2 * resident + scratch + (8 << 20))))

    kernel = functools.partial(_char_rnn_kernel, n_layers=L, hidden=H,
                               seq_len=T, batch_pad=B_pad)
    out_tm, hn, cn = pl.pallas_call(
        kernel,
        out_shape=out_shape,
        grid_spec=pltpu.PrefetchScalarGridSpec(
            num_scalar_prefetch=0,
            grid=(1,),
            in_specs=in_specs,
            out_specs=out_specs,
            scratch_shapes=scratch_shapes,
        ),
        compiler_params=pltpu.CompilerParams(
            dimension_semantics=("arbitrary",),
            vmem_limit_bytes=vmem_limit),
    )(*args)

    # Drop padding and reorder rows t*B+b -> b*T+t to match out.view(-1, n_hidden).
    out = out_tm.reshape(T, B_pad, V_pad)[:, :B, :V_out]
    out = jnp.transpose(out, (1, 0, 2)).reshape(B * T, V_out)
    return out, (hn[:, :B, :], cn[:, :B, :])


# -----------------------------------------------------------------------------
# Pure-JAX reference (mimics the kernel's bf16 matmul inputs / f32 accumulation,
# standard PyTorch [i,f,g,o] gate order and jax.nn.sigmoid).
# -----------------------------------------------------------------------------
def char_rnn_reference(x, hidden, params):
    h0_all, c0_all = hidden
    n_layers = h0_all.shape[0]
    B, T, _ = x.shape
    H = h0_all.shape[-1]
    layer_in = x
    h_out, c_out = [], []
    for l in range(n_layers):
        p = params["lstm"][l]
        w_ih = p["w_ih_t"].astype(jnp.bfloat16)
        w_hh = p["w_hh_t"].astype(jnp.bfloat16)
        b = p["b"][0]
        h = h0_all[l]
        c = c0_all[l]
        ys = []
        for t in range(T):
            xt = layer_in[:, t, :].astype(jnp.bfloat16)
            gates = (jnp.dot(xt, w_ih, preferred_element_type=jnp.float32)
                     + jnp.dot(h.astype(jnp.bfloat16), w_hh,
                               preferred_element_type=jnp.float32) + b)
            i_g = jax.nn.sigmoid(gates[:, 0 * H:1 * H])
            f_g = jax.nn.sigmoid(gates[:, 1 * H:2 * H])
            g_g = jnp.tanh(gates[:, 2 * H:3 * H])
            o_g = jax.nn.sigmoid(gates[:, 3 * H:4 * H])
            c = f_g * c + i_g * g_g
            h = o_g * jnp.tanh(c)
            ys.append(h)
        layer_in = jnp.stack(ys, axis=1)
        h_out.append(h)
        c_out.append(c)
    flat = layer_in.reshape(B * T, H).astype(jnp.bfloat16)
    out = (jnp.dot(flat, params["fc"]["w_t"].astype(jnp.bfloat16),
                   preferred_element_type=jnp.float32) + params["fc"]["b"][0])
    return out, (jnp.stack(h_out, 0), jnp.stack(c_out, 0))


# -----------------------------------------------------------------------------
if __name__ == "__main__":
    # Small, TPU-friendly shapes consistent with CharRNN's forward.
    VOCAB = 32        # len(tokens)
    N_HIDDEN = 32
    N_LAYERS = 2
    B, T = 2, 8

    key = jax.random.PRNGKey(0)
    keys = iter(jax.random.split(key, 32))
    bound = 1.0 / np.sqrt(N_HIDDEN)

    def uni(shape):
        return jax.random.uniform(next(keys), shape, jnp.float32, -bound, bound)

    lstm_params = []
    for l in range(N_LAYERS):
        in_size = VOCAB if l == 0 else N_HIDDEN
        w_ih = uni((4 * N_HIDDEN, in_size))     # PyTorch layout (4H, in), order i,f,g,o
        w_hh = uni((4 * N_HIDDEN, N_HIDDEN))
        b_ih = uni((4 * N_HIDDEN,))
        b_hh = uni((4 * N_HIDDEN,))
        lstm_params.append({
            "w_ih_t": w_ih.T,                   # (in, 4H)
            "w_hh_t": w_hh.T,                   # (H, 4H)
            "b": (b_ih + b_hh).reshape(1, 4 * N_HIDDEN),
        })
    fc_w = uni((VOCAB, N_HIDDEN))               # PyTorch Linear (out, in)
    fc_b = uni((VOCAB,))
    params = {
        "lstm": lstm_params,
        "fc": {"w_t": fc_w.T, "b": fc_b.reshape(1, VOCAB)},
    }

    x = jax.random.normal(next(keys), (B, T, VOCAB), jnp.float32)
    # init_hidden: zeros, shape (n_layers, B, n_hidden)
    h0 = jnp.zeros((N_LAYERS, B, N_HIDDEN), jnp.float32)
    c0 = jnp.zeros((N_LAYERS, B, N_HIDDEN), jnp.float32)

    fwd = jax.jit(char_rnn_forward)
    out, (hn, cn) = fwd(x, (h0, c0), params)
    out = jax.block_until_ready(out)
    hn = jax.block_until_ready(hn)
    cn = jax.block_until_ready(cn)

    ref_out, (ref_hn, ref_cn) = char_rnn_reference(x, (h0, c0), params)
    np.testing.assert_allclose(np.asarray(out), np.asarray(ref_out),
                               rtol=2e-3, atol=2e-3)
    np.testing.assert_allclose(np.asarray(hn), np.asarray(ref_hn),
                               rtol=2e-3, atol=2e-3)
    np.testing.assert_allclose(np.asarray(cn), np.asarray(ref_cn),
                               rtol=2e-3, atol=2e-3)

    assert out.shape == (B * T, VOCAB)
    assert hn.shape == (N_LAYERS, B, N_HIDDEN)
    print("KERNEL_OK")
</pallas_src>

<mosaic_0001>
module attributes {stable_mosaic.version = 11 : i64} {
  func.func @_char_rnn_kernel(%arg0: i32, %arg1: memref<64x32xbf16, #tpu.memory_space<vmem>>, %arg2: memref<2x8x32xf32, #tpu.memory_space<vmem>>, %arg3: memref<2x8x32xf32, #tpu.memory_space<vmem>>, %arg4: memref<32x128xbf16, #tpu.memory_space<vmem>>, %arg5: memref<32x128xbf16, #tpu.memory_space<vmem>>, %arg6: memref<1x128xf32, #tpu.memory_space<vmem>>, %arg7: memref<32x128xbf16, #tpu.memory_space<vmem>>, %arg8: memref<32x128xbf16, #tpu.memory_space<vmem>>, %arg9: memref<1x128xf32, #tpu.memory_space<vmem>>, %arg10: memref<32x128xbf16, #tpu.memory_space<vmem>>, %arg11: memref<1x128xf32, #tpu.memory_space<vmem>>, %arg12: memref<64x128xf32, #tpu.memory_space<vmem>>, %arg13: memref<2x8x32xf32, #tpu.memory_space<vmem>>, %arg14: memref<2x8x32xf32, #tpu.memory_space<vmem>>, %arg15: memref<64x32xbf16, #tpu.memory_space<vmem>>, %arg16: memref<64x128xf32, #tpu.memory_space<vmem>>) attributes {dimension_semantics = [#tpu.dimension_semantics<arbitrary>], iteration_bounds = array<i64: 1>, scalar_prefetch = 0 : i64, scratch_operands = 2 : i64, tpu.core_type = #tpu.core_type<tc>, window_params = [{pipeline_mode = #tpu.pipeline_mode<synchronous>, transform_indices = @transform_0, window_bounds = array<i64: 64, 32>}, {pipeline_mode = #tpu.pipeline_mode<synchronous>, transform_indices = @transform_1, window_bounds = array<i64: 2, 8, 32>}, {pipeline_mode = #tpu.pipeline_mode<synchronous>, transform_indices = @transform_2, window_bounds = array<i64: 2, 8, 32>}, {pipeline_mode = #tpu.pipeline_mode<synchronous>, transform_indices = @transform_3, window_bounds = array<i64: 32, 128>}, {pipeline_mode = #tpu.pipeline_mode<synchronous>, transform_indices = @transform_4, window_bounds = array<i64: 32, 128>}, {pipeline_mode = #tpu.pipeline_mode<synchronous>, transform_indices = @transform_5, window_bounds = array<i64: 1, 128>}, {pipeline_mode = #tpu.pipeline_mode<synchronous>, transform_indices = @transform_6, window_bounds = array<i64: 32, 128>}, {pipeline_mode = #tpu.pipeline_mode<synchronous>, transform_indices = @transform_7, window_bounds = array<i64: 32, 128>}, {pipeline_mode = #tpu.pipeline_mode<synchronous>, transform_indices = @transform_8, window_bounds = array<i64: 1, 128>}, {pipeline_mode = #tpu.pipeline_mode<synchronous>, transform_indices = @transform_9, window_bounds = array<i64: 32, 128>}, {pipeline_mode = #tpu.pipeline_mode<synchronous>, transform_indices = @transform_10, window_bounds = array<i64: 1, 128>}, {pipeline_mode = #tpu.pipeline_mode<synchronous>, transform_indices = @transform_11, window_bounds = array<i64: 64, 128>}, {pipeline_mode = #tpu.pipeline_mode<synchronous>, transform_indices = @transform_12, window_bounds = array<i64: 2, 8, 32>}, {pipeline_mode = #tpu.pipeline_mode<synchronous>, transform_indices = @transform_13, window_bounds = array<i64: 2, 8, 32>}]} {
    %c0 = arith.constant 0 : index
    %c0_0 = arith.constant 0 : index
    %0 = vector.load %arg4[%c0, %c0_0] : memref<32x128xbf16, #tpu.memory_space<vmem>>, vector<32x128xbf16>
    %c0_1 = arith.constant 0 : index
    %c0_2 = arith.constant 0 : index
    %1 = vector.load %arg5[%c0_1, %c0_2] : memref<32x128xbf16, #tpu.memory_space<vmem>>, vector<32x128xbf16>
    %c0_3 = arith.constant 0 : index
    %c0_4 = arith.constant 0 : index
    %2 = vector.load %arg6[%c0_3, %c0_4] : memref<1x128xf32, #tpu.memory_space<vmem>>, vector<1x128xf32>
    %c0_5 = arith.constant 0 : index
    %c0_6 = arith.constant 0 : index
    %3 = vector.load %arg1[%c0_5, %c0_6] : memref<64x32xbf16, #tpu.memory_space<vmem>>, vector<64x32xbf16>
    %cst = arith.constant dense<0.000000e+00> : vector<64x128xf32>
    %4 = tpu.matmul %3, %0, %cst {dimension_numbers = #tpu.dot_dimension_numbers<[1], [0], [0], [1], [0, 0, 1, 1], [], []>} : vector<64x32xbf16>, vector<32x128xbf16>, vector<64x128xf32> -> vector<64x128xf32>
    %5 = vector.broadcast %2 : vector<1x128xf32> to vector<64x128xf32>
    %6 = arith.addf %4, %5 : vector<64x128xf32>
    %c0_7 = arith.constant 0 : index
    %c0_8 = arith.constant 0 : index
    %7 = vector.load %arg16[%c0_7, %c0_8] : memref<64x128xf32, #tpu.memory_space<vmem>>, vector<64x128xf32>
    tpu.vector_store %arg16[%c0_7, %c0_8], %6 {strides = array<i32>} : memref<64x128xf32, #tpu.memory_space<vmem>>, vector<64x128xf32>,
    %c0_9 = arith.constant 0 : index
    %c0_10 = arith.constant 0 : index
    %c0_11 = arith.constant 0 : index
    %8 = vector.load %arg2[%c0_9, %c0_10, %c0_11] : memref<2x8x32xf32, #tpu.memory_space<vmem>>, vector<1x8x32xf32>
    %9 = vector.shape_cast %8 : vector<1x8x32xf32> to vector<8x32xf32>
    %c0_12 = arith.constant 0 : index
    %c0_13 = arith.constant 0 : index
    %c0_14 = arith.constant 0 : index
    %10 = vector.load %arg3[%c0_12, %c0_13, %c0_14] : memref<2x8x32xf32, #tpu.memory_space<vmem>>, vector<1x8x32xf32>
    %11 = vector.shape_cast %10 : vector<1x8x32xf32> to vector<8x32xf32>
    %c0_15 = arith.constant 0 : index
    %c0_16 = arith.constant 0 : index
    %12 = vector.load %arg16[%c0_15, %c0_16] : memref<64x128xf32, #tpu.memory_space<vmem>>, vector<8x128xf32>
    %13 = arith.truncf %9 : vector<8x32xf32> to vector<8x32xbf16>
    %cst_17 = arith.constant dense<0.000000e+00> : vector<8x128xf32>
    %14 = tpu.matmul %13, %1, %cst_17 {dimension_numbers = #tpu.dot_dimension_numbers<[1], [0], [0], [1], [0, 0, 1, 1], [], []>} : vector<8x32xbf16>, vector<32x128xbf16>, vector<8x128xf32> -> vector<8x128xf32>
    %15 = arith.addf %12, %14 : vector<8x128xf32>
    %16 = vector.extract_strided_slice %15 {offsets = [0, 0], sizes = [8, 96], strides = [1, 1]} : vector<8x128xf32> to vector<8x96xf32>
    %cst_18 = arith.constant 5.000000e-01 : f32
    %17 = vector.broadcast %cst_18 : f32 to vector<8x96xf32>
    %18 = arith.mulf %17, %16 : vector<8x96xf32>
    %19 = math.tanh %18 : vector<8x96xf32>
    %cst_19 = arith.constant 5.000000e-01 : f32
    %20 = vector.broadcast %cst_19 : f32 to vector<8x96xf32>
    %21 = arith.mulf %20, %19 : vector<8x96xf32>
    %cst_20 = arith.constant 5.000000e-01 : f32
    %22 = vector.broadcast %cst_20 : f32 to vector<8x96xf32>
    %23 = arith.addf %21, %22 : vector<8x96xf32>
    %24 = vector.extract_strided_slice %15 {offsets = [0, 96], sizes = [8, 32], strides = [1, 1]} : vector<8x128xf32> to vector<8x32xf32>
    %25 = math.tanh %24 : vector<8x32xf32>
    %26 = vector.extract_strided_slice %23 {offsets = [0, 0], sizes = [8, 32], strides = [1, 1]} : vector<8x96xf32> to vector<8x32xf32>
    %27 = vector.extract_strided_slice %23 {offsets = [0, 32], sizes = [8, 32], strides = [1, 1]} : vector<8x96xf32> to vector<8x32xf32>
    %28 = vector.extract_strided_slice %23 {offsets = [0, 64], sizes = [8, 32], strides = [1, 1]} : vector<8x96xf32> to vector<8x32xf32>
    %29 = arith.mulf %27, %11 : vector<8x32xf32>
    %30 = arith.mulf %26, %25 : vector<8x32xf32>
    %31 = arith.addf %29, %30 : vector<8x32xf32>
    %32 = math.tanh %31 : vector<8x32xf32>
    %33 = arith.mulf %28, %32 : vector<8x32xf32>
    %34 = arith.truncf %33 : vector<8x32xf32> to vector<8x32xbf16>
    %c0_21 = arith.constant 0 : index
    %c0_22 = arith.constant 0 : index
    %35 = vector.load %arg15[%c0_21, %c0_22] : memref<64x32xbf16, #tpu.memory_space<vmem>>, vector<8x32xbf16>
    tpu.vector_store %arg15[%c0_21, %c0_22], %34 {strides = array<i32>} : memref<64x32xbf16, #tpu.memory_space<vmem>>, vector<8x32xbf16>,
    %c8 = arith.constant 8 : index
    %c0_23 = arith.constant 0 : index
    %36 = vector.load %arg16[%c8, %c0_23] : memref<64x128xf32, #tpu.memory_space<vmem>>, vector<8x128xf32>
    %37 = arith.truncf %33 : vector<8x32xf32> to vector<8x32xbf16>
    %cst_24 = arith.constant dense<0.000000e+00> : vector<8x128xf32>
    %38 = tpu.matmul %37, %1, %cst_24 {dimension_numbers = #tpu.dot_dimension_numbers<[1], [0], [0], [1], [0, 0, 1, 1], [], []>} : vector<8x32xbf16>, vector<32x128xbf16>, vector<8x128xf32> -> vector<8x128xf32>
    %39 = arith.addf %36, %38 : vector<8x128xf32>
    %40 = vector.extract_strided_slice %39 {offsets = [0, 0], sizes = [8, 96], strides = [1, 1]} : vector<8x128xf32> to vector<8x96xf32>
    %cst_25 = arith.constant 5.000000e-01 : f32
    %41 = vector.broadcast %cst_25 : f32 to vector<8x96xf32>
    %42 = arith.mulf %41, %40 : vector<8x96xf32>
    %43 = math.tanh %42 : vector<8x96xf32>
    %cst_26 = arith.constant 5.000000e-01 : f32
    %44 = vector.broadcast %cst_26 : f32 to vector<8x96xf32>
    %45 = arith.mulf %44, %43 : vector<8x96xf32>
    %cst_27 = arith.constant 5.000000e-01 : f32
    %46 = vector.broadcast %cst_27 : f32 to vector<8x96xf32>
    %47 = arith.addf %45, %46 : vector<8x96xf32>
    %48 = vector.extract_strided_slice %39 {offsets = [0, 96], sizes = [8, 32], strides = [1, 1]} : vector<8x128xf32> to vector<8x32xf32>
    %49 = math.tanh %48 : vector<8x32xf32>
    %50 = vector.extract_strided_slice %47 {offsets = [0, 0], sizes = [8, 32], strides = [1, 1]} : vector<8x96xf32> to vector<8x32xf32>
    %51 = vector.extract_strided_slice %47 {offsets = [0, 32], sizes = [8, 32], strides = [1, 1]} : vector<8x96xf32> to vector<8x32xf32>
    %52 = vector.extract_strided_slice %47 {offsets = [0, 64], sizes = [8, 32], strides = [1, 1]} : vector<8x96xf32> to vector<8x32xf32>
    %53 = arith.mulf %51, %31 : vector<8x32xf32>
    %54 = arith.mulf %50, %49 : vector<8x32xf32>
    %55 = arith.addf %53, %54 : vector<8x32xf32>
    %56 = math.tanh %55 : vector<8x32xf32>
    %57 = arith.mulf %52, %56 : vector<8x32xf32>
    %58 = arith.truncf %57 : vector<8x32xf32> to vector<8x32xbf16>
    %c8_28 = arith.constant 8 : index
    %c0_29 = arith.constant 0 : index
    %59 = vector.load %arg15[%c8_28, %c0_29] : memref<64x32xbf16, #tpu.memory_space<vmem>>, vector<8x32xbf16>
    tpu.vector_store %arg15[%c8_28, %c0_29], %58 {strides = array<i32>} : memref<64x32xbf16, #tpu.memory_space<vmem>>, vector<8x32xbf16>,
    %c16 = arith.constant 16 : index
    %c0_30 = arith.constant 0 : index
    %60 = vector.load %arg16[%c16, %c0_30] : memref<64x128xf32, #tpu.memory_space<vmem>>, vector<8x128xf32>
    %61 = arith.truncf %57 : vector<8x32xf32> to vector<8x32xbf16>
    %cst_31 = arith.constant dense<0.000000e+00> : vector<8x128xf32>
    %62 = tpu.matmul %61, %1, %cst_31 {dimension_numbers = #tpu.dot_dimension_numbers<[1], [0], [0], [1], [0, 0, 1, 1], [], []>} : vector<8x32xbf16>, vector<32x128xbf16>, vector<8x128xf32> -> vector<8x128xf32>
    %63 = arith.addf %60, %62 : vector<8x128xf32>
    %64 = vector.extract_strided_slice %63 {offsets = [0, 0], sizes = [8, 96], strides = [1, 1]} : vector<8x128xf32> to vector<8x96xf32>
    %cst_32 = arith.constant 5.000000e-01 : f32
    %65 = vector.broadcast %cst_32 : f32 to vector<8x96xf32>
    %66 = arith.mulf %65, %64 : vector<8x96xf32>
    %67 = math.tanh %66 : vector<8x96xf32>
    %cst_33 = arith.constant 5.000000e-01 : f32
    %68 = vector.broadcast %cst_33 : f32 to vector<8x96xf32>
    %69 = arith.mulf %68, %67 : vector<8x96xf32>
    %cst_34 = arith.constant 5.000000e-01 : f32
    %70 = vector.broadcast %cst_34 : f32 to vector<8x96xf32>
    %71 = arith.addf %69, %70 : vector<8x96xf32>
    %72 = vector.extract_strided_slice %63 {offsets = [0, 96], sizes = [8, 32], strides = [1, 1]} : vector<8x128xf32> to vector<8x32xf32>
    %73 = math.tanh %72 : vector<8x32xf32>
    %74 = vector.extract_strided_slice %71 {offsets = [0, 0], sizes = [8, 32], strides = [1, 1]} : vector<8x96xf32> to vector<8x32xf32>
    %75 = vector.extract_strided_slice %71 {offsets = [0, 32], sizes = [8, 32], strides = [1, 1]} : vector<8x96xf32> to vector<8x32xf32>
    %76 = vector.extract_strided_slice %71 {offsets = [0, 64], sizes = [8, 32], strides = [1, 1]} : vector<8x96xf32> to vector<8x32xf32>
    %77 = arith.mulf %75, %55 : vector<8x32xf32>
    %78 = arith.mulf %74, %73 : vector<8x32xf32>
    %79 = arith.addf %77, %78 : vector<8x32xf32>
    %80 = math.tanh %79 : vector<8x32xf32>
    %81 = arith.mulf %76, %80 : vector<8x32xf32>
    %82 = arith.truncf %81 : vector<8x32xf32> to vector<8x32xbf16>
    %c16_35 = arith.constant 16 : index
    %c0_36 = arith.constant 0 : index
    %83 = vector.load %arg15[%c16_35, %c0_36] : memref<64x32xbf16, #tpu.memory_space<vmem>>, vector<8x32xbf16>
    tpu.vector_store %arg15[%c16_35, %c0_36], %82 {strides = array<i32>} : memref<64x32xbf16, #tpu.memory_space<vmem>>, vector<8x32xbf16>,
    %c24 = arith.constant 24 : index
    %c0_37 = arith.constant 0 : index
    %84 = vector.load %arg16[%c24, %c0_37] : memref<64x128xf32, #tpu.memory_space<vmem>>, vector<8x128xf32>
    %85 = arith.truncf %81 : vector<8x32xf32> to vector<8x32xbf16>
    %cst_38 = arith.constant dense<0.000000e+00> : vector<8x128xf32>
    %86 = tpu.matmul %85, %1, %cst_38 {dimension_numbers = #tpu.dot_dimension_numbers<[1], [0], [0], [1], [0, 0, 1, 1], [], []>} : vector<8x32xbf16>, vector<32x128xbf16>, vector<8x128xf32> -> vector<8x128xf32>
    %87 = arith.addf %84, %86 : vector<8x128xf32>
    %88 = vector.extract_strided_slice %87 {offsets = [0, 0], sizes = [8, 96], strides = [1, 1]} : vector<8x128xf32> to vector<8x96xf32>
    %cst_39 = arith.constant 5.000000e-01 : f32
    %89 = vector.broadcast %cst_39 : f32 to vector<8x96xf32>
    %90 = arith.mulf %89, %88 : vector<8x96xf32>
    %91 = math.tanh %90 : vector<8x96xf32>
    %cst_40 = arith.constant 5.000000e-01 : f32
    %92 = vector.broadcast %cst_40 : f32 to vector<8x96xf32>
    %93 = arith.mulf %92, %91 : vector<8x96xf32>
    %cst_41 = arith.constant 5.000000e-01 : f32
    %94 = vector.broadcast %cst_41 : f32 to vector<8x96xf32>
    %95 = arith.addf %93, %94 : vector<8x96xf32>
    %96 = vector.extract_strided_slice %87 {offsets = [0, 96], sizes = [8, 32], strides = [1, 1]} : vector<8x128xf32> to vector<8x32xf32>
    %97 = math.tanh %96 : vector<8x32xf32>
    %98 = vector.extract_strided_slice %95 {offsets = [0, 0], sizes = [8, 32], strides = [1, 1]} : vector<8x96xf32> to vector<8x32xf32>
    %99 = vector.extract_strided_slice %95 {offsets = [0, 32], sizes = [8, 32], strides = [1, 1]} : vector<8x96xf32> to vector<8x32xf32>
    %100 = vector.extract_strided_slice %95 {offsets = [0, 64], sizes = [8, 32], strides = [1, 1]} : vector<8x96xf32> to vector<8x32xf32>
    %101 = arith.mulf %99, %79 : vector<8x32xf32>
    %102 = arith.mulf %98, %97 : vector<8x32xf32>
    %103 = arith.addf %101, %102 : vector<8x32xf32>
    %104 = math.tanh %103 : vector<8x32xf32>
    %105 = arith.mulf %100, %104 : vector<8x32xf32>
    %106 = arith.truncf %105 : vector<8x32xf32> to vector<8x32xbf16>
    %c24_42 = arith.constant 24 : index
    %c0_43 = arith.constant 0 : index
    %107 = vector.load %arg15[%c24_42, %c0_43] : memref<64x32xbf16, #tpu.memory_space<vmem>>, vector<8x32xbf16>
    tpu.vector_store %arg15[%c24_42, %c0_43], %106 {strides = array<i32>} : memref<64x32xbf16, #tpu.memory_space<vmem>>, vector<8x32xbf16>,
    %c32 = arith.constant 32 : index
    %c0_44 = arith.constant 0 : index
    %108 = vector.load %arg16[%c32, %c0_44] : memref<64x128xf32, #tpu.memory_space<vmem>>, vector<8x128xf32>
    %109 = arith.truncf %105 : vector<8x32xf32> to vector<8x32xbf16>
    %cst_45 = arith.constant dense<0.000000e+00> : vector<8x128xf32>
    %110 = tpu.matmul %109, %1, %cst_45 {dimension_numbers = #tpu.dot_dimension_numbers<[1], [0], [0], [1], [0, 0, 1, 1], [], []>} : vector<8x32xbf16>, vector<32x128xbf16>, vector<8x128xf32> -> vector<8x128xf32>
    %111 = arith.addf %108, %110 : vector<8x128xf32>
    %112 = vector.extract_strided_slice %111 {offsets = [0, 0], sizes = [8, 96], strides = [1, 1]} : vector<8x128xf32> to vector<8x96xf32>
    %cst_46 = arith.constant 5.000000e-01 : f32
    %113 = vector.broadcast %cst_46 : f32 to vector<8x96xf32>
    %114 = arith.mulf %113, %112 : vector<8x96xf32>
    %115 = math.tanh %114 : vector<8x96xf32>
    %cst_47 = arith.constant 5.000000e-01 : f32
    %116 = vector.broadcast %cst_47 : f32 to vector<8x96xf32>
    %117 = arith.mulf %116, %115 : vector<8x96xf32>
    %cst_48 = arith.constant 5.000000e-01 : f32
    %118 = vector.broadcast %cst_48 : f32 to vector<8x96xf32>
    %119 = arith.addf %117, %118 : vector<8x96xf32>
    %120 = vector.extract_strided_slice %111 {offsets = [0, 96], sizes = [8, 32], strides = [1, 1]} : vector<8x128xf32> to vector<8x32xf32>
    %121 = math.tanh %120 : vector<8x32xf32>
    %122 = vector.extract_strided_slice %119 {offsets = [0, 0], sizes = [8, 32], strides = [1, 1]} : vector<8x96xf32> to vector<8x32xf32>
    %123 = vector.extract_strided_slice %119 {offsets = [0, 32], sizes = [8, 32], strides = [1, 1]} : vector<8x96xf32> to vector<8x32xf32>
    %124 = vector.extract_strided_slice %119 {offsets = [0, 64], sizes = [8, 32], strides = [1, 1]} : vector<8x96xf32> to vector<8x32xf32>
    %125 = arith.mulf %123, %103 : vector<8x32xf32>
    %126 = arith.mulf %122, %121 : vector<8x32xf32>
    %127 = arith.addf %125, %126 : vector<8x32xf32>
    %128 = math.tanh %127 : vector<8x32xf32>
    %129 = arith.mulf %124, %128 : vector<8x32xf32>
    %130 = arith.truncf %129 : vector<8x32xf32> to vector<8x32xbf16>
    %c32_49 = arith.constant 32 : index
    %c0_50 = arith.constant 0 : index
    %131 = vector.load %arg15[%c32_49, %c0_50] : memref<64x32xbf16, #tpu.memory_space<vmem>>, vector<8x32xbf16>
    tpu.vector_store %arg15[%c32_49, %c0_50], %130 {strides = array<i32>} : memref<64x32xbf16, #tpu.memory_space<vmem>>, vector<8x32xbf16>,
    %c40 = arith.constant 40 : index
    %c0_51 = arith.constant 0 : index
    %132 = vector.load %arg16[%c40, %c0_51] : memref<64x128xf32, #tpu.memory_space<vmem>>, vector<8x128xf32>
    %133 = arith.truncf %129 : vector<8x32xf32> to vector<8x32xbf16>
    %cst_52 = arith.constant dense<0.000000e+00> : vector<8x128xf32>
    %134 = tpu.matmul %133, %1, %cst_52 {dimension_numbers = #tpu.dot_dimension_numbers<[1], [0], [0], [1], [0, 0, 1, 1], [], []>} : vector<8x32xbf16>, vector<32x128xbf16>, vector<8x128xf32> -> vector<8x128xf32>
    %135 = arith.addf %132, %134 : vector<8x128xf32>
    %136 = vector.extract_strided_slice %135 {offsets = [0, 0], sizes = [8, 96], strides = [1, 1]} : vector<8x128xf32> to vector<8x96xf32>
    %cst_53 = arith.constant 5.000000e-01 : f32
    %137 = vector.broadcast %cst_53 : f32 to vector<8x96xf32>
    %138 = arith.mulf %137, %136 : vector<8x96xf32>
    %139 = math.tanh %138 : vector<8x96xf32>
    %cst_54 = arith.constant 5.000000e-01 : f32
    %140 = vector.broadcast %cst_54 : f32 to vector<8x96xf32>
    %141 = arith.mulf %140, %139 : vector<8x96xf32>
    %cst_55 = arith.constant 5.000000e-01 : f32
    %142 = vector.broadcast %cst_55 : f32 to vector<8x96xf32>
    %143 = arith.addf %141, %142 : vector<8x96xf32>
    %144 = vector.extract_strided_slice %135 {offsets = [0, 96], sizes = [8, 32], strides = [1, 1]} : vector<8x128xf32> to vector<8x32xf32>
    %145 = math.tanh %144 : vector<8x32xf32>
    %146 = vector.extract_strided_slice %143 {offsets = [0, 0], sizes = [8, 32], strides = [1, 1]} : vector<8x96xf32> to vector<8x32xf32>
    %147 = vector.extract_strided_slice %143 {offsets = [0, 32], sizes = [8, 32], strides = [1, 1]} : vector<8x96xf32> to vector<8x32xf32>
    %148 = vector.extract_strided_slice %143 {offsets = [0, 64], sizes = [8, 32], strides = [1, 1]} : vector<8x96xf32> to vector<8x32xf32>
    %149 = arith.mulf %147, %127 : vector<8x32xf32>
    %150 = arith.mulf %146, %145 : vector<8x32xf32>
    %151 = arith.addf %149, %150 : vector<8x32xf32>
    %152 = math.tanh %151 : vector<8x32xf32>
    %153 = arith.mulf %148, %152 : vector<8x32xf32>
    %154 = arith.truncf %153 : vector<8x32xf32> to vector<8x32xbf16>
    %c40_56 = arith.constant 40 : index
    %c0_57 = arith.constant 0 : index
    %155 = vector.load %arg15[%c40_56, %c0_57] : memref<64x32xbf16, #tpu.memory_space<vmem>>, vector<8x32xbf16>
    tpu.vector_store %arg15[%c40_56, %c0_57], %154 {strides = array<i32>} : memref<64x32xbf16, #tpu.memory_space<vmem>>, vector<8x32xbf16>,
    %c48 = arith.constant 48 : index
    %c0_58 = arith.constant 0 : index
    %156 = vector.load %arg16[%c48, %c0_58] : memref<64x128xf32, #tpu.memory_space<vmem>>, vector<8x128xf32>
    %157 = arith.truncf %153 : vector<8x32xf32> to vector<8x32xbf16>
    %cst_59 = arith.constant dense<0.000000e+00> : vector<8x128xf32>
    %158 = tpu.matmul %157, %1, %cst_59 {dimension_numbers = #tpu.dot_dimension_numbers<[1], [0], [0], [1], [0, 0, 1, 1], [], []>} : vector<8x32xbf16>, vector<32x128xbf16>, vector<8x128xf32> -> vector<8x128xf32>
    %159 = arith.addf %156, %158 : vector<8x128xf32>
    %160 = vector.extract_strided_slice %159 {offsets = [0, 0], sizes = [8, 96], strides = [1, 1]} : vector<8x128xf32> to vector<8x96xf32>
    %cst_60 = arith.constant 5.000000e-01 : f32
    %161 = vector.broadcast %cst_60 : f32 to vector<8x96xf32>
    %162 = arith.mulf %161, %160 : vector<8x96xf32>
    %163 = math.tanh %162 : vector<8x96xf32>
    %cst_61 = arith.constant 5.000000e-01 : f32
    %164 = vector.broadcast %cst_61 : f32 to vector<8x96xf32>
    %165 = arith.mulf %164, %163 : vector<8x96xf32>
    %cst_62 = arith.constant 5.000000e-01 : f32
    %166 = vector.broadcast %cst_62 : f32 to vector<8x96xf32>
    %167 = arith.addf %165, %166 : vector<8x96xf32>
    %168 = vector.extract_strided_slice %159 {offsets = [0, 96], sizes = [8, 32], strides = [1, 1]} : vector<8x128xf32> to vector<8x32xf32>
    %169 = math.tanh %168 : vector<8x32xf32>
    %170 = vector.extract_strided_slice %167 {offsets = [0, 0], sizes = [8, 32], strides = [1, 1]} : vector<8x96xf32> to vector<8x32xf32>
    %171 = vector.extract_strided_slice %167 {offsets = [0, 32], sizes = [8, 32], strides = [1, 1]} : vector<8x96xf32> to vector<8x32xf32>
    %172 = vector.extract_strided_slice %167 {offsets = [0, 64], sizes = [8, 32], strides = [1, 1]} : vector<8x96xf32> to vector<8x32xf32>
    %173 = arith.mulf %171, %151 : vector<8x32xf32>
    %174 = arith.mulf %170, %169 : vector<8x32xf32>
    %175 = arith.addf %173, %174 : vector<8x32xf32>
    %176 = math.tanh %175 : vector<8x32xf32>
    %177 = arith.mulf %172, %176 : vector<8x32xf32>
    %178 = arith.truncf %177 : vector<8x32xf32> to vector<8x32xbf16>
    %c48_63 = arith.constant 48 : index
    %c0_64 = arith.constant 0 : index
    %179 = vector.load %arg15[%c48_63, %c0_64] : memref<64x32xbf16, #tpu.memory_space<vmem>>, vector<8x32xbf16>
    tpu.vector_store %arg15[%c48_63, %c0_64], %178 {strides = array<i32>} : memref<64x32xbf16, #tpu.memory_space<vmem>>, vector<8x32xbf16>,
    %c56 = arith.constant 56 : index
    %c0_65 = arith.constant 0 : index
    %180 = vector.load %arg16[%c56, %c0_65] : memref<64x128xf32, #tpu.memory_space<vmem>>, vector<8x128xf32>
    %181 = arith.truncf %177 : vector<8x32xf32> to vector<8x32xbf16>
    %cst_66 = arith.constant dense<0.000000e+00> : vector<8x128xf32>
    %182 = tpu.matmul %181, %1, %cst_66 {dimension_numbers = #tpu.dot_dimension_numbers<[1], [0], [0], [1], [0, 0, 1, 1], [], []>} : vector<8x32xbf16>, vector<32x128xbf16>, vector<8x128xf32> -> vector<8x128xf32>
    %183 = arith.addf %180, %182 : vector<8x128xf32>
    %184 = vector.extract_strided_slice %183 {offsets = [0, 0], sizes = [8, 96], strides = [1, 1]} : vector<8x128xf32> to vector<8x96xf32>
    %cst_67 = arith.constant 5.000000e-01 : f32
    %185 = vector.broadcast %cst_67 : f32 to vector<8x96xf32>
    %186 = arith.mulf %185, %184 : vector<8x96xf32>
    %187 = math.tanh %186 : vector<8x96xf32>
    %cst_68 = arith.constant 5.000000e-01 : f32
    %188 = vector.broadcast %cst_68 : f32 to vector<8x96xf32>
    %189 = arith.mulf %188, %187 : vector<8x96xf32>
    %cst_69 = arith.constant 5.000000e-01 : f32
    %190 = vector.broadcast %cst_69 : f32 to vector<8x96xf32>
    %191 = arith.addf %189, %190 : vector<8x96xf32>
    %192 = vector.extract_strided_slice %183 {offsets = [0, 96], sizes = [8, 32], strides = [1, 1]} : vector<8x128xf32> to vector<8x32xf32>
    %193 = math.tanh %192 : vector<8x32xf32>
    %194 = vector.extract_strided_slice %191 {offsets = [0, 0], sizes = [8, 32], strides = [1, 1]} : vector<8x96xf32> to vector<8x32xf32>
    %195 = vector.extract_strided_slice %191 {offsets = [0, 32], sizes = [8, 32], strides = [1, 1]} : vector<8x96xf32> to vector<8x32xf32>
    %196 = vector.extract_strided_slice %191 {offsets = [0, 64], sizes = [8, 32], strides = [1, 1]} : vector<8x96xf32> to vector<8x32xf32>
    %197 = arith.mulf %195, %175 : vector<8x32xf32>
    %198 = arith.mulf %194, %193 : vector<8x32xf32>
    %199 = arith.addf %197, %198 : vector<8x32xf32>
    %200 = math.tanh %199 : vector<8x32xf32>
    %201 = arith.mulf %196, %200 : vector<8x32xf32>
    %202 = arith.truncf %201 : vector<8x32xf32> to vector<8x32xbf16>
    %c56_70 = arith.constant 56 : index
    %c0_71 = arith.constant 0 : index
    %203 = vector.load %arg15[%c56_70, %c0_71] : memref<64x32xbf16, #tpu.memory_space<vmem>>, vector<8x32xbf16>
    tpu.vector_store %arg15[%c56_70, %c0_71], %202 {strides = array<i32>} : memref<64x32xbf16, #tpu.memory_space<vmem>>, vector<8x32xbf16>,
    %c0_72 = arith.constant 0 : index
    %c0_73 = arith.constant 0 : index
    %c0_74 = arith.constant 0 : index
    %204 = vector.load %arg13[%c0_72, %c0_73, %c0_74] : memref<2x8x32xf32, #tpu.memory_space<vmem>>, vector<1x8x32xf32>
    %205 = vector.shape_cast %204 : vector<1x8x32xf32> to vector<8x32xf32>
    %206 = vector.shape_cast %201 : vector<8x32xf32> to vector<1x8x32xf32>
    tpu.vector_store %arg13[%c0_72, %c0_73, %c0_74], %206 {strides = array<i32>} : memref<2x8x32xf32, #tpu.memory_space<vmem>>, vector<1x8x32xf32>,
    %c0_75 = arith.constant 0 : index
    %c0_76 = arith.constant 0 : index
    %c0_77 = arith.constant 0 : index
    %207 = vector.load %arg14[%c0_75, %c0_76, %c0_77] : memref<2x8x32xf32, #tpu.memory_space<vmem>>, vector<1x8x32xf32>
    %208 = vector.shape_cast %207 : vector<1x8x32xf32> to vector<8x32xf32>
    %209 = vector.shape_cast %199 : vector<8x32xf32> to vector<1x8x32xf32>
    tpu.vector_store %arg14[%c0_75, %c0_76, %c0_77], %209 {strides = array<i32>} : memref<2x8x32xf32, #tpu.memory_space<vmem>>, vector<1x8x32xf32>,
    %c0_78 = arith.constant 0 : index
    %c0_79 = arith.constant 0 : index
    %210 = vector.load %arg7[%c0_78, %c0_79] : memref<32x128xbf16, #tpu.memory_space<vmem>>, vector<32x128xbf16>
    %c0_80 = arith.constant 0 : index
    %c0_81 = arith.constant 0 : index
    %211 = vector.load %arg8[%c0_80, %c0_81] : memref<32x128xbf16, #tpu.memory_space<vmem>>, vector<32x128xbf16>
    %c0_82 = arith.constant 0 : index
    %c0_83 = arith.constant 0 : index
    %212 = vector.load %arg9[%c0_82, %c0_83] : memref<1x128xf32, #tpu.memory_space<vmem>>, vector<1x128xf32>
    %c0_84 = arith.constant 0 : index
    %c0_85 = arith.constant 0 : index
    %213 = vector.load %arg15[%c0_84, %c0_85] : memref<64x32xbf16, #tpu.memory_space<vmem>>, vector<64x32xbf16>
    %cst_86 = arith.constant dense<0.000000e+00> : vector<64x128xf32>
    %214 = tpu.matmul %213, %210, %cst_86 {dimension_numbers = #tpu.dot_dimension_numbers<[1], [0], [0], [1], [0, 0, 1, 1], [], []>} : vector<64x32xbf16>, vector<32x128xbf16>, vector<64x128xf32> -> vector<64x128xf32>
    %215 = vector.broadcast %212 : vector<1x128xf32> to vector<64x128xf32>
    %216 = arith.addf %214, %215 : vector<64x128xf32>
    %c0_87 = arith.constant 0 : index
    %c0_88 = arith.constant 0 : index
    %217 = vector.load %arg16[%c0_87, %c0_88] : memref<64x128xf32, #tpu.memory_space<vmem>>, vector<64x128xf32>
    tpu.vector_store %arg16[%c0_87, %c0_88], %216 {strides = array<i32>} : memref<64x128xf32, #tpu.memory_space<vmem>>, vector<64x128xf32>,
    %c1 = arith.constant 1 : index
    %c0_89 = arith.constant 0 : index
    %c0_90 = arith.constant 0 : index
    %218 = vector.load %arg2[%c1, %c0_89, %c0_90] : memref<2x8x32xf32, #tpu.memory_space<vmem>>, vector<1x8x32xf32>
    %219 = vector.shape_cast %218 : vector<1x8x32xf32> to vector<8x32xf32>
    %c1_91 = arith.constant 1 : index
    %c0_92 = arith.constant 0 : index
    %c0_93 = arith.constant 0 : index
    %220 = vector.load %arg3[%c1_91, %c0_92, %c0_93] : memref<2x8x32xf32, #tpu.memory_space<vmem>>, vector<1x8x32xf32>
    %221 = vector.shape_cast %220 : vector<1x8x32xf32> to vector<8x32xf32>
    %c0_94 = arith.constant 0 : index
    %c0_95 = arith.constant 0 : index
    %222 = vector.load %arg16[%c0_94, %c0_95] : memref<64x128xf32, #tpu.memory_space<vmem>>, vector<8x128xf32>
    %223 = arith.truncf %219 : vector<8x32xf32> to vector<8x32xbf16>
    %cst_96 = arith.constant dense<0.000000e+00> : vector<8x128xf32>
    %224 = tpu.matmul %223, %211, %cst_96 {dimension_numbers = #tpu.dot_dimension_numbers<[1], [0], [0], [1], [0, 0, 1, 1], [], []>} : vector<8x32xbf16>, vector<32x128xbf16>, vector<8x128xf32> -> vector<8x128xf32>
    %225 = arith.addf %222, %224 : vector<8x128xf32>
    %226 = vector.extract_strided_slice %225 {offsets = [0, 0], sizes = [8, 96], strides = [1, 1]} : vector<8x128xf32> to vector<8x96xf32>
    %cst_97 = arith.constant 5.000000e-01 : f32
    %227 = vector.broadcast %cst_97 : f32 to vector<8x96xf32>
    %228 = arith.mulf %227, %226 : vector<8x96xf32>
    %229 = math.tanh %228 : vector<8x96xf32>
    %cst_98 = arith.constant 5.000000e-01 : f32
    %230 = vector.broadcast %cst_98 : f32 to vector<8x96xf32>
    %231 = arith.mulf %230, %229 : vector<8x96xf32>
    %cst_99 = arith.constant 5.000000e-01 : f32
    %232 = vector.broadcast %cst_99 : f32 to vector<8x96xf32>
    %233 = arith.addf %231, %232 : vector<8x96xf32>
    %234 = vector.extract_strided_slice %225 {offsets = [0, 96], sizes = [8, 32], strides = [1, 1]} : vector<8x128xf32> to vector<8x32xf32>
    %235 = math.tanh %234 : vector<8x32xf32>
    %236 = vector.extract_strided_slice %233 {offsets = [0, 0], sizes = [8, 32], strides = [1, 1]} : vector<8x96xf32> to vector<8x32xf32>
    %237 = vector.extract_strided_slice %233 {offsets = [0, 32], sizes = [8, 32], strides = [1, 1]} : vector<8x96xf32> to vector<8x32xf32>
    %238 = vector.extract_strided_slice %233 {offsets = [0, 64], sizes = [8, 32], strides = [1, 1]} : vector<8x96xf32> to vector<8x32xf32>
    %239 = arith.mulf %237, %221 : vector<8x32xf32>
    %240 = arith.mulf %236, %235 : vector<8x32xf32>
    %241 = arith.addf %239, %240 : vector<8x32xf32>
    %242 = math.tanh %241 : vector<8x32xf32>
    %243 = arith.mulf %238, %242 : vector<8x32xf32>
    %244 = arith.truncf %243 : vector<8x32xf32> to vector<8x32xbf16>
    %c0_100 = arith.constant 0 : index
    %c0_101 = arith.constant 0 : index
    %245 = vector.load %arg15[%c0_100, %c0_101] : memref<64x32xbf16, #tpu.memory_space<vmem>>, vector<8x32xbf16>
    tpu.vector_store %arg15[%c0_100, %c0_101], %244 {strides = array<i32>} : memref<64x32xbf16, #tpu.memory_space<vmem>>, vector<8x32xbf16>,
    %c8_102 = arith.constant 8 : index
    %c0_103 = arith.constant 0 : index
    %246 = vector.load %arg16[%c8_102, %c0_103] : memref<64x128xf32, #tpu.memory_space<vmem>>, vector<8x128xf32>
    %247 = arith.truncf %243 : vector<8x32xf32> to vector<8x32xbf16>
    %cst_104 = arith.constant dense<0.000000e+00> : vector<8x128xf32>
    %248 = tpu.matmul %247, %211, %cst_104 {dimension_numbers = #tpu.dot_dimension_numbers<[1], [0], [0], [1], [0, 0, 1, 1], [], []>} : vector<8x32xbf16>, vector<32x128xbf16>, vector<8x128xf32> -> vector<8x128xf32>
    %249 = arith.addf %246, %248 : vector<8x128xf32>
    %250 = vector.extract_strided_slice %249 {offsets = [0, 0], sizes = [8, 96], strides = [1, 1]} : vector<8x128xf32> to vector<8x96xf32>
    %cst_105 = arith.constant 5.000000e-01 : f32
    %251 = vector.broadcast %cst_105 : f32 to vector<8x96xf32>
    %252 = arith.mulf %251, %250 : vector<8x96xf32>
    %253 = math.tanh %252 : vector<8x96xf32>
    %cst_106 = arith.constant 5.000000e-01 : f32
    %254 = vector.broadcast %cst_106 : f32 to vector<8x96xf32>
    %255 = arith.mulf %254, %253 : vector<8x96xf32>
    %cst_107 = arith.constant 5.000000e-01 : f32
    %256 = vector.broadcast %cst_107 : f32 to vector<8x96xf32>
    %257 = arith.addf %255, %256 : vector<8x96xf32>
    %258 = vector.extract_strided_slice %249 {offsets = [0, 96], sizes = [8, 32], strides = [1, 1]} : vector<8x128xf32> to vector<8x32xf32>
    %259 = math.tanh %258 : vector<8x32xf32>
    %260 = vector.extract_strided_slice %257 {offsets = [0, 0], sizes = [8, 32], strides = [1, 1]} : vector<8x96xf32> to vector<8x32xf32>
    %261 = vector.extract_strided_slice %257 {offsets = [0, 32], sizes = [8, 32], strides = [1, 1]} : vector<8x96xf32> to vector<8x32xf32>
    %262 = vector.extract_strided_slice %257 {offsets = [0, 64], sizes = [8, 32], strides = [1, 1]} : vector<8x96xf32> to vector<8x32xf32>
    %263 = arith.mulf %261, %241 : vector<8x32xf32>
    %264 = arith.mulf %260, %259 : vector<8x32xf32>
    %265 = arith.addf %263, %264 : vector<8x32xf32>
    %266 = math.tanh %265 : vector<8x32xf32>
    %267 = arith.mulf %262, %266 : vector<8x32xf32>
    %268 = arith.truncf %267 : vector<8x32xf32> to vector<8x32xbf16>
    %c8_108 = arith.constant 8 : index
    %c0_109 = arith.constant 0 : index
    %269 = vector.load %arg15[%c8_108, %c0_109] : memref<64x32xbf16, #tpu.memory_space<vmem>>, vector<8x32xbf16>
    tpu.vector_store %arg15[%c8_108, %c0_109], %268 {strides = array<i32>} : memref<64x32xbf16, #tpu.memory_space<vmem>>, vector<8x32xbf16>,
    %c16_110 = arith.constant 16 : index
    %c0_111 = arith.constant 0 : index
    %270 = vector.load %arg16[%c16_110, %c0_111] : memref<64x128xf32, #tpu.memory_space<vmem>>, vector<8x128xf32>
    %271 = arith.truncf %267 : vector<8x32xf32> to vector<8x32xbf16>
    %cst_112 = arith.constant dense<0.000000e+00> : vector<8x128xf32>
    %272 = tpu.matmul %271, %211, %cst_112 {dimension_numbers = #tpu.dot_dimension_numbers<[1], [0], [0], [1], [0, 0, 1, 1], [], []>} : vector<8x32xbf16>, vector<32x128xbf16>, vector<8x128xf32> -> vector<8x128xf32>
    %273 = arith.addf %270, %272 : vector<8x128xf32>
    %274 = vector.extract_strided_slice %273 {offsets = [0, 0], sizes = [8, 96], strides = [1, 1]} : vector<8x128xf32> to vector<8x96xf32>
    %cst_113 = arith.constant 5.000000e-01 : f32
    %275 = vector.broadcast %cst_113 : f32 to vector<8x96xf32>
    %276 = arith.mulf %275, %274 : vector<8x96xf32>
    %277 = math.tanh %276 : vector<8x96xf32>
    %cst_114 = arith.constant 5.000000e-01 : f32
    %278 = vector.broadcast %cst_114 : f32 to vector<8x96xf32>
    %279 = arith.mulf %278, %277 : vector<8x96xf32>
    %cst_115 = arith.constant 5.000000e-01 : f32
    %280 = vector.broadcast %cst_115 : f32 to vector<8x96xf32>
    %281 = arith.addf %279, %280 : vector<8x96xf32>
    %282 = vector.extract_strided_slice %273 {offsets = [0, 96], sizes = [8, 32], strides = [1, 1]} : vector<8x128xf32> to vector<8x32xf32>
    %283 = math.tanh %282 : vector<8x32xf32>
    %284 = vector.extract_strided_slice %281 {offsets = [0, 0], sizes = [8, 32], strides = [1, 1]} : vector<8x96xf32> to vector<8x32xf32>
    %285 = vector.extract_strided_slice %281 {offsets = [0, 32], sizes = [8, 32], strides = [1, 1]} : vector<8x96xf32> to vector<8x32xf32>
    %286 = vector.extract_strided_slice %281 {offsets = [0, 64], sizes = [8, 32], strides = [1, 1]} : vector<8x96xf32> to vector<8x32xf32>
    %287 = arith.mulf %285, %265 : vector<8x32xf32>
    %288 = arith.mulf %284, %283 : vector<8x32xf32>
    %289 = arith.addf %287, %288 : vector<8x32xf32>
    %290 = math.tanh %289 : vector<8x32xf32>
    %291 = arith.mulf %286, %290 : vector<8x32xf32>
    %292 = arith.truncf %291 : vector<8x32xf32> to vector<8x32xbf16>
    %c16_116 = arith.constant 16 : index
    %c0_117 = arith.constant 0 : index
    %293 = vector.load %arg15[%c16_116, %c0_117] : memref<64x32xbf16, #tpu.memory_space<vmem>>, vector<8x32xbf16>
    tpu.vector_store %arg15[%c16_116, %c0_117], %292 {strides = array<i32>} : memref<64x32xbf16, #tpu.memory_space<vmem>>, vector<8x32xbf16>,
    %c24_118 = arith.constant 24 : index
    %c0_119 = arith.constant 0 : index
    %294 = vector.load %arg16[%c24_118, %c0_119] : memref<64x128xf32, #tpu.memory_space<vmem>>, vector<8x128xf32>
    %295 = arith.truncf %291 : vector<8x32xf32> to vector<8x32xbf16>
    %cst_120 = arith.constant dense<0.000000e+00> : vector<8x128xf32>
    %296 = tpu.matmul %295, %211, %cst_120 {dimension_numbers = #tpu.dot_dimension_numbers<[1], [0], [0], [1], [0, 0, 1, 1], [], []>} : vector<8x32xbf16>, vector<32x128xbf16>, vector<8x128xf32> -> vector<8x128xf32>
    %297 = arith.addf %294, %296 : vector<8x128xf32>
    %298 = vector.extract_strided_slice %297 {offsets = [0, 0], sizes = [8, 96], strides = [1, 1]} : vector<8x128xf32> to vector<8x96xf32>
    %cst_121 = arith.constant 5.000000e-01 : f32
    %299 = vector.broadcast %cst_121 : f32 to vector<8x96xf32>
    %300 = arith.mulf %299, %298 : vector<8x96xf32>
    %301 = math.tanh %300 : vector<8x96xf32>
    %cst_122 = arith.constant 5.000000e-01 : f32
    %302 = vector.broadcast %cst_122 : f32 to vector<8x96xf32>
    %303 = arith.mulf %302, %301 : vector<8x96xf32>
    %cst_123 = arith.constant 5.000000e-01 : f32
    %304 = vector.broadcast %cst_123 : f32 to vector<8x96xf32>
    %305 = arith.addf %303, %304 : vector<8x96xf32>
    %306 = vector.extract_strided_slice %297 {offsets = [0, 96], sizes = [8, 32], strides = [1, 1]} : vector<8x128xf32> to vector<8x32xf32>
    %307 = math.tanh %306 : vector<8x32xf32>
    %308 = vector.extract_strided_slice %305 {offsets = [0, 0], sizes = [8, 32], strides = [1, 1]} : vector<8x96xf32> to vector<8x32xf32>
    %309 = vector.extract_strided_slice %305 {offsets = [0, 32], sizes = [8, 32], strides = [1, 1]} : vector<8x96xf32> to vector<8x32xf32>
    %310 = vector.extract_strided_slice %305 {offsets = [0, 64], sizes = [8, 32], strides = [1, 1]} : vector<8x96xf32> to vector<8x32xf32>
    %311 = arith.mulf %309, %289 : vector<8x32xf32>
    %312 = arith.mulf %308, %307 : vector<8x32xf32>
    %313 = arith.addf %311, %312 : vector<8x32xf32>
    %314 = math.tanh %313 : vector<8x32xf32>
    %315 = arith.mulf %310, %314 : vector<8x32xf32>
    %316 = arith.truncf %315 : vector<8x32xf32> to vector<8x32xbf16>
    %c24_124 = arith.constant 24 : index
    %c0_125 = arith.constant 0 : index
    %317 = vector.load %arg15[%c24_124, %c0_125] : memref<64x32xbf16, #tpu.memory_space<vmem>>, vector<8x32xbf16>
    tpu.vector_store %arg15[%c24_124, %c0_125], %316 {strides = array<i32>} : memref<64x32xbf16, #tpu.memory_space<vmem>>, vector<8x32xbf16>,
    %c32_126 = arith.constant 32 : index
    %c0_127 = arith.constant 0 : index
    %318 = vector.load %arg16[%c32_126, %c0_127] : memref<64x128xf32, #tpu.memory_space<vmem>>, vector<8x128xf32>
    %319 = arith.truncf %315 : vector<8x32xf32> to vector<8x32xbf16>
    %cst_128 = arith.constant dense<0.000000e+00> : vector<8x128xf32>
    %320 = tpu.matmul %319, %211, %cst_128 {dimension_numbers = #tpu.dot_dimension_numbers<[1], [0], [0], [1], [0, 0, 1, 1], [], []>} : vector<8x32xbf16>, vector<32x128xbf16>, vector<8x128xf32> -> vector<8x128xf32>
    %321 = arith.addf %318, %320 : vector<8x128xf32>
    %322 = vector.extract_strided_slice %321 {offsets = [0, 0], sizes = [8, 96], strides = [1, 1]} : vector<8x128xf32> to vector<8x96xf32>
    %cst_129 = arith.constant 5.000000e-01 : f32
    %323 = vector.broadcast %cst_129 : f32 to vector<8x96xf32>
    %324 = arith.mulf %323, %322 : vector<8x96xf32>
    %325 = math.tanh %324 : vector<8x96xf32>
    %cst_130 = arith.constant 5.000000e-01 : f32
    %326 = vector.broadcast %cst_130 : f32 to vector<8x96xf32>
    %327 = arith.mulf %326, %325 : vector<8x96xf32>
    %cst_131 = arith.constant 5.000000e-01 : f32
    %328 = vector.broadcast %cst_131 : f32 to vector<8x96xf32>
    %329 = arith.addf %327, %328 : vector<8x96xf32>
    %330 = vector.extract_strided_slice %321 {offsets = [0, 96], sizes = [8, 32], strides = [1, 1]} : vector<8x128xf32> to vector<8x32xf32>
    %331 = math.tanh %330 : vector<8x32xf32>
    %332 = vector.extract_strided_slice %329 {offsets = [0, 0], sizes = [8, 32], strides = [1, 1]} : vector<8x96xf32> to vector<8x32xf32>
    %333 = vector.extract_strided_slice %329 {offsets = [0, 32], sizes = [8, 32], strides = [1, 1]} : vector<8x96xf32> to vector<8x32xf32>
    %334 = vector.extract_strided_slice %329 {offsets = [0, 64], sizes = [8, 32], strides = [1, 1]} : vector<8x96xf32> to vector<8x32xf32>
    %335 = arith.mulf %333, %313 : vector<8x32xf32>
    %336 = arith.mulf %332, %331 : vector<8x32xf32>
    %337 = arith.addf %335, %336 : vector<8x32xf32>
    %338 = math.tanh %337 : vector<8x32xf32>
    %339 = arith.mulf %334, %338 : vector<8x32xf32>
    %340 = arith.truncf %339 : vector<8x32xf32> to vector<8x32xbf16>
    %c32_132 = arith.constant 32 : index
    %c0_133 = arith.constant 0 : index
    %341 = vector.load %arg15[%c32_132, %c0_133] : memref<64x32xbf16, #tpu.memory_space<vmem>>, vector<8x32xbf16>
    tpu.vector_store %arg15[%c32_132, %c0_133], %340 {strides = array<i32>} : memref<64x32xbf16, #tpu.memory_space<vmem>>, vector<8x32xbf16>,
    %c40_134 = arith.constant 40 : index
    %c0_135 = arith.constant 0 : index
    %342 = vector.load %arg16[%c40_134, %c0_135] : memref<64x128xf32, #tpu.memory_space<vmem>>, vector<8x128xf32>
    %343 = arith.truncf %339 : vector<8x32xf32> to vector<8x32xbf16>
    %cst_136 = arith.constant dense<0.000000e+00> : vector<8x128xf32>
    %344 = tpu.matmul %343, %211, %cst_136 {dimension_numbers = #tpu.dot_dimension_numbers<[1], [0], [0], [1], [0, 0, 1, 1], [], []>} : vector<8x32xbf16>, vector<32x128xbf16>, vector<8x128xf32> -> vector<8x128xf32>
    %345 = arith.addf %342, %344 : vector<8x128xf32>
    %346 = vector.extract_strided_slice %345 {offsets = [0, 0], sizes = [8, 96], strides = [1, 1]} : vector<8x128xf32> to vector<8x96xf32>
    %cst_137 = arith.constant 5.000000e-01 : f32
    %347 = vector.broadcast %cst_137 : f32 to vector<8x96xf32>
    %348 = arith.mulf %347, %346 : vector<8x96xf32>
    %349 = math.tanh %348 : vector<8x96xf32>
    %cst_138 = arith.constant 5.000000e-01 : f32
    %350 = vector.broadcast %cst_138 : f32 to vector<8x96xf32>
    %351 = arith.mulf %350, %349 : vector<8x96xf32>
    %cst_139 = arith.constant 5.000000e-01 : f32
    %352 = vector.broadcast %cst_139 : f32 to vector<8x96xf32>
    %353 = arith.addf %351, %352 : vector<8x96xf32>
    %354 = vector.extract_strided_slice %345 {offsets = [0, 96], sizes = [8, 32], strides = [1, 1]} : vector<8x128xf32> to vector<8x32xf32>
    %355 = math.tanh %354 : vector<8x32xf32>
    %356 = vector.extract_strided_slice %353 {offsets = [0, 0], sizes = [8, 32], strides = [1, 1]} : vector<8x96xf32> to vector<8x32xf32>
    %357 = vector.extract_strided_slice %353 {offsets = [0, 32], sizes = [8, 32], strides = [1, 1]} : vector<8x96xf32> to vector<8x32xf32>
    %358 = vector.extract_strided_slice %353 {offsets = [0, 64], sizes = [8, 32], strides = [1, 1]} : vector<8x96xf32> to vector<8x32xf32>
    %359 = arith.mulf %357, %337 : vector<8x32xf32>
    %360 = arith.mulf %356, %355 : vector<8x32xf32>
    %361 = arith.addf %359, %360 : vector<8x32xf32>
    %362 = math.tanh %361 : vector<8x32xf32>
    %363 = arith.mulf %358, %362 : vector<8x32xf32>
    %364 = arith.truncf %363 : vector<8x32xf32> to vector<8x32xbf16>
    %c40_140 = arith.constant 40 : index
    %c0_141 = arith.constant 0 : index
    %365 = vector.load %arg15[%c40_140, %c0_141] : memref<64x32xbf16, #tpu.memory_space<vmem>>, vector<8x32xbf16>
    tpu.vector_store %arg15[%c40_140, %c0_141], %364 {strides = array<i32>} : memref<64x32xbf16, #tpu.memory_space<vmem>>, vector<8x32xbf16>,
    %c48_142 = arith.constant 48 : index
    %c0_143 = arith.constant 0 : index
    %366 = vector.load %arg16[%c48_142, %c0_143] : memref<64x128xf32, #tpu.memory_space<vmem>>, vector<8x128xf32>
    %367 = arith.truncf %363 : vector<8x32xf32> to vector<8x32xbf16>
    %cst_144 = arith.constant dense<0.000000e+00> : vector<8x128xf32>
    %368 = tpu.matmul %367, %211, %cst_144 {dimension_numbers = #tpu.dot_dimension_numbers<[1], [0], [0], [1], [0, 0, 1, 1], [], []>} : vector<8x32xbf16>, vector<32x128xbf16>, vector<8x128xf32> -> vector<8x128xf32>
    %369 = arith.addf %366, %368 : vector<8x128xf32>
    %370 = vector.extract_strided_slice %369 {offsets = [0, 0], sizes = [8, 96], strides = [1, 1]} : vector<8x128xf32> to vector<8x96xf32>
    %cst_145 = arith.constant 5.000000e-01 : f32
    %371 = vector.broadcast %cst_145 : f32 to vector<8x96xf32>
    %372 = arith.mulf %371, %370 : vector<8x96xf32>
    %373 = math.tanh %372 : vector<8x96xf32>
    %cst_146 = arith.constant 5.000000e-01 : f32
    %374 = vector.broadcast %cst_146 : f32 to vector<8x96xf32>
    %375 = arith.mulf %374, %373 : vector<8x96xf32>
    %cst_147 = arith.constant 5.000000e-01 : f32
    %376 = vector.broadcast %cst_147 : f32 to vector<8x96xf32>
    %377 = arith.addf %375, %376 : vector<8x96xf32>
    %378 = vector.extract_strided_slice %369 {offsets = [0, 96], sizes = [8, 32], strides = [1, 1]} : vector<8x128xf32> to vector<8x32xf32>
    %379 = math.tanh %378 : vector<8x32xf32>
    %380 = vector.extract_strided_slice %377 {offsets = [0, 0], sizes = [8, 32], strides = [1, 1]} : vector<8x96xf32> to vector<8x32xf32>
    %381 = vector.extract_strided_slice %377 {offsets = [0, 32], sizes = [8, 32], strides = [1, 1]} : vector<8x96xf32> to vector<8x32xf32>
    %382 = vector.extract_strided_slice %377 {offsets = [0, 64], sizes = [8, 32], strides = [1, 1]} : vector<8x96xf32> to vector<8x32xf32>
    %383 = arith.mulf %381, %361 : vector<8x32xf32>
    %384 = arith.mulf %380, %379 : vector<8x32xf32>
    %385 = arith.addf %383, %384 : vector<8x32xf32>
    %386 = math.tanh %385 : vector<8x32xf32>
    %387 = arith.mulf %382, %386 : vector<8x32xf32>
    %388 = arith.truncf %387 : vector<8x32xf32> to vector<8x32xbf16>
    %c48_148 = arith.constant 48 : index
    %c0_149 = arith.constant 0 : index
    %389 = vector.load %arg15[%c48_148, %c0_149] : memref<64x32xbf16, #tpu.memory_space<vmem>>, vector<8x32xbf16>
    tpu.vector_store %arg15[%c48_148, %c0_149], %388 {strides = array<i32>} : memref<64x32xbf16, #tpu.memory_space<vmem>>, vector<8x32xbf16>,
    %c56_150 = arith.constant 56 : index
    %c0_151 = arith.constant 0 : index
    %390 = vector.load %arg16[%c56_150, %c0_151] : memref<64x128xf32, #tpu.memory_space<vmem>>, vector<8x128xf32>
    %391 = arith.truncf %387 : vector<8x32xf32> to vector<8x32xbf16>
    %cst_152 = arith.constant dense<0.000000e+00> : vector<8x128xf32>
    %392 = tpu.matmul %391, %211, %cst_152 {dimension_numbers = #tpu.dot_dimension_numbers<[1], [0], [0], [1], [0, 0, 1, 1], [], []>} : vector<8x32xbf16>, vector<32x128xbf16>, vector<8x128xf32> -> vector<8x128xf32>
    %393 = arith.addf %390, %392 : vector<8x128xf32>
    %394 = vector.extract_strided_slice %393 {offsets = [0, 0], sizes = [8, 96], strides = [1, 1]} : vector<8x128xf32> to vector<8x96xf32>
    %cst_153 = arith.constant 5.000000e-01 : f32
    %395 = vector.broadcast %cst_153 : f32 to vector<8x96xf32>
    %396 = arith.mulf %395, %394 : vector<8x96xf32>
    %397 = math.tanh %396 : vector<8x96xf32>
    %cst_154 = arith.constant 5.000000e-01 : f32
    %398 = vector.broadcast %cst_154 : f32 to vector<8x96xf32>
    %399 = arith.mulf %398, %397 : vector<8x96xf32>
    %cst_155 = arith.constant 5.000000e-01 : f32
    %400 = vector.broadcast %cst_155 : f32 to vector<8x96xf32>
    %401 = arith.addf %399, %400 : vector<8x96xf32>
    %402 = vector.extract_strided_slice %393 {offsets = [0, 96], sizes = [8, 32], strides = [1, 1]} : vector<8x128xf32> to vector<8x32xf32>
    %403 = math.tanh %402 : vector<8x32xf32>
    %404 = vector.extract_strided_slice %401 {offsets = [0, 0], sizes = [8, 32], strides = [1, 1]} : vector<8x96xf32> to vector<8x32xf32>
    %405 = vector.extract_strided_slice %401 {offsets = [0, 32], sizes = [8, 32], strides = [1, 1]} : vector<8x96xf32> to vector<8x32xf32>
    %406 = vector.extract_strided_slice %401 {offsets = [0, 64], sizes = [8, 32], strides = [1, 1]} : vector<8x96xf32> to vector<8x32xf32>
    %407 = arith.mulf %405, %385 : vector<8x32xf32>
    %408 = arith.mulf %404, %403 : vector<8x32xf32>
    %409 = arith.addf %407, %408 : vector<8x32xf32>
    %410 = math.tanh %409 : vector<8x32xf32>
    %411 = arith.mulf %406, %410 : vector<8x32xf32>
    %412 = arith.truncf %411 : vector<8x32xf32> to vector<8x32xbf16>
    %c56_156 = arith.constant 56 : index
    %c0_157 = arith.constant 0 : index
    %413 = vector.load %arg15[%c56_156, %c0_157] : memref<64x32xbf16, #tpu.memory_space<vmem>>, vector<8x32xbf16>
    tpu.vector_store %arg15[%c56_156, %c0_157], %412 {strides = array<i32>} : memref<64x32xbf16, #tpu.memory_space<vmem>>, vector<8x32xbf16>,
    %c1_158 = arith.constant 1 : index
    %c0_159 = arith.constant 0 : index
    %c0_160 = arith.constant 0 : index
    %414 = vector.load %arg13[%c1_158, %c0_159, %c0_160] : memref<2x8x32xf32, #tpu.memory_space<vmem>>, vector<1x8x32xf32>
    %415 = vector.shape_cast %414 : vector<1x8x32xf32> to vector<8x32xf32>
    %416 = vector.shape_cast %411 : vector<8x32xf32> to vector<1x8x32xf32>
    tpu.vector_store %arg13[%c1_158, %c0_159, %c0_160], %416 {strides = array<i32>} : memref<2x8x32xf32, #tpu.memory_space<vmem>>, vector<1x8x32xf32>,
    %c1_161 = arith.constant 1 : index
    %c0_162 = arith.constant 0 : index
    %c0_163 = arith.constant 0 : index
    %417 = vector.load %arg14[%c1_161, %c0_162, %c0_163] : memref<2x8x32xf32, #tpu.memory_space<vmem>>, vector<1x8x32xf32>
    %418 = vector.shape_cast %417 : vector<1x8x32xf32> to vector<8x32xf32>
    %419 = vector.shape_cast %409 : vector<8x32xf32> to vector<1x8x32xf32>
    tpu.vector_store %arg14[%c1_161, %c0_162, %c0_163], %419 {strides = array<i32>} : memref<2x8x32xf32, #tpu.memory_space<vmem>>, vector<1x8x32xf32>,
    %c0_164 = arith.constant 0 : index
    %c0_165 = arith.constant 0 : index
    %420 = vector.load %arg15[%c0_164, %c0_165] : memref<64x32xbf16, #tpu.memory_space<vmem>>, vector<64x32xbf16>
    %c0_166 = arith.constant 0 : index
    %c0_167 = arith.constant 0 : index
    %421 = vector.load %arg10[%c0_166, %c0_167] : memref<32x128xbf16, #tpu.memory_space<vmem>>, vector<32x128xbf16>
    %cst_168 = arith.constant dense<0.000000e+00> : vector<64x128xf32>
    %422 = tpu.matmul %420, %421, %cst_168 {dimension_numbers = #tpu.dot_dimension_numbers<[1], [0], [0], [1], [0, 0, 1, 1], [], []>} : vector<64x32xbf16>, vector<32x128xbf16>, vector<64x128xf32> -> vector<64x128xf32>
    %c0_169 = arith.constant 0 : index
    %c0_170 = arith.constant 0 : index
    %423 = vector.load %arg11[%c0_169, %c0_170] : memref<1x128xf32, #tpu.memory_space<vmem>>, vector<1x128xf32>
    %424 = vector.broadcast %423 : vector<1x128xf32> to vector<64x128xf32>
    %425 = arith.addf %422, %424 : vector<64x128xf32>
    %c0_171 = arith.constant 0 : index
    %c0_172 = arith.constant 0 : index
    %426 = vector.load %arg12[%c0_171, %c0_172] : memref<64x128xf32, #tpu.memory_space<vmem>>, vector<64x128xf32>
    tpu.vector_store %arg12[%c0_171, %c0_172], %425 {strides = array<i32>} : memref<64x128xf32, #tpu.memory_space<vmem>>, vector<64x128xf32>,
    return
  }
  func.func @transform_0(%arg0: i32) -> (i32, i32) {
    %c0_i32 = arith.constant 0 : i32
    %c0_i32_0 = arith.constant 0 : i32
    %c0_i32_1 = arith.constant 0 : i32
    return %c0_i32, %c0_i32_0 : i32, i32
  }
  func.func @transform_1(%arg0: i32) -> (i32, i32, i32) {
    %c0_i32 = arith.constant 0 : i32
    %c0_i32_0 = arith.constant 0 : i32
    %c0_i32_1 = arith.constant 0 : i32
    %c0_i32_2 = arith.constant 0 : i32
    return %c0_i32, %c0_i32_0, %c0_i32_1 : i32, i32, i32
  }
  func.func @transform_2(%arg0: i32) -> (i32, i32, i32) {
    %c0_i32 = arith.constant 0 : i32
    %c0_i32_0 = arith.constant 0 : i32
    %c0_i32_1 = arith.constant 0 : i32
    %c0_i32_2 = arith.constant 0 : i32
    return %c0_i32, %c0_i32_0, %c0_i32_1 : i32, i32, i32
  }
  func.func @transform_3(%arg0: i32) -> (i32, i32) {
    %c0_i32 = arith.constant 0 : i32
    %c0_i32_0 = arith.constant 0 : i32
    %c0_i32_1 = arith.constant 0 : i32
    return %c0_i32, %c0_i32_0 : i32, i32
  }
  func.func @transform_4(%arg0: i32) -> (i32, i32) {
    %c0_i32 = arith.constant 0 : i32
    %c0_i32_0 = arith.constant 0 : i32
    %c0_i32_1 = arith.constant 0 : i32
    return %c0_i32, %c0_i32_0 : i32, i32
  }
  func.func @transform_5(%arg0: i32) -> (i32, i32) {
    %c0_i32 = arith.constant 0 : i32
    %c0_i32_0 = arith.constant 0 : i32
    %c0_i32_1 = arith.constant 0 : i32
    return %c0_i32, %c0_i32_0 : i32, i32
  }
  func.func @transform_6(%arg0: i32) -> (i32, i32) {
    %c0_i32 = arith.constant 0 : i32
    %c0_i32_0 = arith.constant 0 : i32
    %c0_i32_1 = arith.constant 0 : i32
    return %c0_i32, %c0_i32_0 : i32, i32
  }
  func.func @transform_7(%arg0: i32) -> (i32, i32) {
    %c0_i32 = arith.constant 0 : i32
    %c0_i32_0 = arith.constant 0 : i32
    %c0_i32_1 = arith.constant 0 : i32
    return %c0_i32, %c0_i32_0 : i32, i32
  }
  func.func @transform_8(%arg0: i32) -> (i32, i32) {
    %c0_i32 = arith.constant 0 : i32
    %c0_i32_0 = arith.constant 0 : i32
    %c0_i32_1 = arith.constant 0 : i32
    return %c0_i32, %c0_i32_0 : i32, i32
  }
  func.func @transform_9(%arg0: i32) -> (i32, i32) {
    %c0_i32 = arith.constant 0 : i32
    %c0_i32_0 = arith.constant 0 : i32
    %c0_i32_1 = arith.constant 0 : i32
    return %c0_i32, %c0_i32_0 : i32, i32
  }
  func.func @transform_10(%arg0: i32) -> (i32, i32) {
    %c0_i32 = arith.constant 0 : i32
    %c0_i32_0 = arith.constant 0 : i32
    %c0_i32_1 = arith.constant 0 : i32
    return %c0_i32, %c0_i32_0 : i32, i32
  }
  func.func @transform_11(%arg0: i32) -> (i32, i32) {
    %c0_i32 = arith.constant 0 : i32
    %c0_i32_0 = arith.constant 0 : i32
    %c0_i32_1 = arith.constant 0 : i32
    return %c0_i32, %c0_i32_0 : i32, i32
  }
  func.func @transform_12(%arg0: i32) -> (i32, i32, i32) {
    %c0_i32 = arith.constant 0 : i32
    %c0_i32_0 = arith.constant 0 : i32
    %c0_i32_1 = arith.constant 0 : i32
    %c0_i32_2 = arith.constant 0 : i32
    return %c0_i32, %c0_i32_0, %c0_i32_1 : i32, i32, i32
  }
  func.func @transform_13(%arg0: i32) -> (i32, i32, i32) {
    %c0_i32 = arith.constant 0 : i32
    %c0_i32_0 = arith.constant 0 : i32
    %c0_i32_1 = arith.constant 0 : i32
    %c0_i32_2 = arith.constant 0 : i32
    return %c0_i32, %c0_i32_0, %c0_i32_1 : i32, i32, i32
  }
}

</mosaic_0001>

<bundles_post_ra>
// kernel: char_rnn_forward.1
= control target key start
LH: loop header
LB: loop body
LE: loop exit
PB: predicated region body
PF: predicated region fallthrough
CT: control target
= control target key end

     0   :  { %vm97_vm0 = vcmask 261120   ;;  %v2208_v7 = vmov 0.0   ;;  %vm2209_vm1 = vmmov 0   ;;  %s2211_s27 = smov 64   ;;  %vm276_vm2 = vcmask 257024   ;;  %s2727_s3 = inlined_call_operand.vmem [shape: bf16[32,128], index: 3, kind: input, shape index: {}]   ;;  %s2728_s0 = inlined_call_operand.vmem [shape: bf16[64,32], index: 0, kind: input, shape index: {}]   ;;  %s2729_s4 = inlined_call_operand.vmem [shape: bf16[32,128], index: 4, kind: input, shape index: {}]   ;;  %s2730_s1 = inlined_call_operand.vmem [shape: f32[2,8,32], index: 1, kind: input, shape index: {}]   ;;  %s2731_s5 = inlined_call_operand.vmem [shape: f32[1,128], index: 5, kind: input, shape index: {}]   ;;  %s2732_s2 = inlined_call_operand.vmem [shape: f32[2,8,32], index: 2, kind: input, shape index: {}]   ;;  %s2733_s6 = inlined_call_operand.vmem [shape: bf16[32,128], index: 6, kind: input, shape index: {}]   ;;  %s2734_s7 = inlined_call_operand.vmem [shape: bf16[32,128], index: 7, kind: input, shape index: {}]   ;;  %s2735_s8 = inlined_call_operand.vmem [shape: f32[1,128], index: 8, kind: input, shape index: {}]   ;;  %s2736_s9 = inlined_call_operand.vmem [shape: bf16[32,128], index: 9, kind: input, shape index: {}]   ;;  %s2737_s12 = inlined_call_operand.vmem [shape: f32[2,8,32], index: 12, kind: output, shape index: {1}]   ;;  %s2738_s13 = inlined_call_operand.vmem [shape: f32[2,8,32], index: 13, kind: output, shape index: {2}]   ;;  %s2739_s10 = inlined_call_operand.vmem [shape: f32[1,128], index: 10, kind: input, shape index: {}]   ;;  %s2740_s11 = inlined_call_operand.vmem [shape: f32[64,128], index: 11, kind: output, shape index: {0}]  }
   0x1   :  { %v2090_v0 = vld [vmem:[%s2727_s3 + $0x8] sm:$0xff]   ;;  %v2091_v1 = vld [vmem:[%s2727_s3] sm:$0xff]   ;;  %v2093_v3 = vld [vmem:[%s2728_s0 + $0x10] sm:$0xff]  }
   0x2   :  { %1917 = vmatprep.subr.bf16.mxu0 %v2090_v0  ;;  %2081 = vmatprep.subr.bf16.mxu1 %v2090_v0  ;;  %v2092_v2 = vld [vmem:[%s2728_s0] sm:$0xff]   ;;  %v2094_v4 = vld [vmem:[%s2728_s0 + $0x8] sm:$0xff]   ;;  %v2095_v5 = vld [vmem:[%s2728_s0 + $0x18] sm:$0xff]  }
   0x3   :  { %1918 = vmatpush3.bf16.msra.mxu0 %v2090_v0  ;;  %2083 = vmatpush3.bf16.msra.mxu1 %v2090_v0  ;;  %v2306_v6 = vld [vmem:[%s2729_s4 + $0x8] sm:$0xff]   ;;  %v2316_v8 = vld [vmem:[%s2729_s4] sm:$0xff]  }
   0x4   :  { %1919 = vmatprep.subr.bf16.mxu0 %v2091_v1  ;;  %2082 = vmatprep.subr.bf16.mxu1 %v2091_v1  ;;  %v183_v9 = vld [vmem:[%s2730_s1] sm:$0xff] }
   0x5   :  { %1921 = vmatprep.mubr.msk.bf16.mxu0 %vm97_vm0, %v2092_v2  ;;  %1925 = vmatprep.mubr.msk.bf16.mxu1 %vm97_vm0, %v2093_v3  ;;  %v186_v10 = vpack.c.bf16 %v183_v9, %v183_v9  ;;  %v1762_v11 = vld [vmem:[%s2731_s5] ss:$0 sm:$0xff]  ;;  %s2210_s5 = smov 32  }
   0x6   :  { %v184_v32 = vld [vmem:[%s2732_s2] sm:$0xff] }
   0x7   :  { %1920 = vmatpush3.bf16.msra.mxu0 %v2091_v1  ;;  %2084 = vmatpush3.bf16.msra.mxu1 %v2091_v1 }
   0x8   :  { %1929 = vmatprep.subr.bf16.mxu1 %v2208_v7  ;;  %1945 = vmatprep.subr.bf16.mxu0 %v2208_v7 }
   0xa   :  { %1922 = vmatmul.mubr.msk.bf16.vlgmr.msra.gmra.mxu0 %vm97_vm0, %v2094_v4  ;;  %1926 = vmatmul.mubr.msk.bf16.vlgmr.msra.gmra.mxu1 %vm97_vm0, %v2095_v5 }
   0xb   :  { %1930 = vmatpush3.bf16.msra.mxu1 %v2306_v6  ;;  %1933 = vmatprep.mubr.msk.bf16.mxu1 %vm2209_vm1, %v2208_v7 }
   0xc   :  { %1931 = vmatprep.subr.bf16.mxu1 %v2208_v7  ;;  %1946 = vmatpush3.bf16.msra.mxu0 %v2306_v6 }
   0xd   :  { %1947 = vmatprep.subr.bf16.mxu0 %v2208_v7  ;;  %1949 = vmatprep.mubr.msk.bf16.mxu0 %vm2209_vm1, %v2208_v7 }
   0xf   :  { %1932 = vmatpush3.bf16.msra.mxu1 %v2316_v8 }
  0x10   :  { %1937 = vmatprep.subr.bf16.mxu1 %v2208_v7  ;;  %1948 = vmatpush3.bf16.msra.mxu0 %v2316_v8 }
  0x11   :  { %1961 = vmatprep.subr.bf16.mxu0 %v2208_v7 }
  0x12   :  { %1934 = vmatmul.mubr.msk.bf16.vlgmr.msra.gmra.mxu1 %vm97_vm0, %v186_v10 }
  0x13   :  { %1938 = vmatpush3.bf16.msra.mxu1 %v2306_v6  ;;  %1941 = vmatprep.mubr.msk.bf16.mxu1 %vm2209_vm1, %v2208_v7 }
  0x14   :  { %1939 = vmatprep.subr.bf16.mxu1 %v2208_v7 }
  0x17   :  { %1940 = vmatpush3.bf16.msra.mxu1 %v2316_v8 }
  0x18   :  { %1953 = vmatprep.subr.bf16.mxu1 %v2208_v7 }
  0xca   :  { %v1923_v12 = vpop.f32.mrf.mxu0  ;;  %v1927_v13 = vpop.f32.mrf.mxu1 }
  0xcb   :  { %v2342_v14 = vadd.f32 %v1923_v12, %v1762_v11  ;;  %v2344_v15 = vadd.f32 %v1927_v13, %v1762_v11 }
  0xcc   :  { %v144_v16 = vpop.f32.mrf.mxu0  ;;  %v160_v17 = vpop.f32.mrf.mxu1 }
  0xcd   :  { %v2346_v18 = vadd.f32 %v1762_v11, %v160_v17  ;;  %v145_v24 = vadd.f32 %v1762_v11, %v144_v16 }
  0xce   :  { %v1924_v19 = vpop.f32.mrf.mxu0  ;;  %v1928_v20 = vpop.f32.mrf.mxu1 }
  0xcf   :  { %v2348_v21 = vadd.f32 %v1924_v19, %v1762_v11  ;;  %v2350_v22 = vadd.f32 %v1928_v20, %v1762_v11 }
  0xd0   :  { %v163_v23 = vpop.f32.mrf.mxu1  ;;  %v147_v48 = vpop.f32.mrf.mxu0 }
  0xd1   :  { %v2352_v25 = vadd.f32 %v1762_v11, %v163_v23  ;;  %v148_v49 = vadd.f32 %v1762_v11, %v147_v48 }
  0xd2   :  { %v236_v26 = vpop.f32.mrf.mxu1 }
  0xd3   :  { %v242_v27 = vadd.f32 %v236_v26, %v145_v24 }
  0xd4   :  { %v1935_v28 = vpop.f32.mrf.mxu1 }
  0xd5   :  { %2112 = vtanh.f32 %v242_v27  ;;  %v243_v33 = vmul.f32 0.5, %v242_v27 }
  0xd6   :  { %v239_v29 = vpop.f32.mrf.mxu1 }
  0xd7   :  { %2114 = vtanh.f32 %v243_v33 }
  0xd8   :  { %v1936_v30 = vpop.f32.mrf.mxu1 }
  0xe2   :  { %v2113_v31 = vpop.eup %2112 }
  0xe3   :  { %254 = vrot.lane.b32.xlu0 %v2113_v31, %s2210_s5 }
  0xe4   :  { %v2115_v34 = vpop.eup %2114 }
  0xe5   :  { %v245_v35 = vmul.f32 0.5, %v2115_v34 }
  0xe7   :  { %249 = vrot.lane.b32.xlu0 %v184_v32, %s2210_s5  ;;  %v246_v36 = vadd.f32 0.5, %v245_v35 }
 0x155   :  { %v255_v37 = vpop.permute.xlu0 %254 }
 0x156   :  { %v257_v38 = vmul.f32 %v255_v37, %v246_v36 }
 0x158   :  { %259 = vrot.lane.b32.xlu1 %v257_v38, %s2210_s5 }
 0x159   :  { %v250_v39 = vpop.permute.xlu0 %249 }
 0x15a   :  { %v252_v40 = vmul.f32 %v250_v39, %v246_v36 }
 0x1ca   :  { %v260_v41 = vpop.permute.xlu1 %259 }
 0x1cb   :  { %v262_v42 = vadd.f32 %v260_v41, %v252_v40 }
 0x1cd   :  { %2116 = vtanh.f32 %v262_v42 }
 0x1da   :  { %v2117_v43 = vpop.eup %2116 }
 0x1db   :  { %265 = vrot.lane.b32.xlu1 %v2117_v43, %s2210_s5 }
 0x24d   :  { %v266_v44 = vpop.permute.xlu1 %265 }
 0x24e   :  { %v268_v45 = vmul.f32 %v266_v44, %v246_v36 }
 0x250   :  { %v2361_v46 = vpack.c.bf16 %v268_v45, %v268_v45 }
 0x252   :  { %279 = vrot.lane.b32.xlu0 %v2361_v46, %s2211_s27 }
 0x2c4   :  { %v280_v47 = vpop.permute.xlu0 %279 }
 0x2c5   :  { %1942 = vmatmul.mubr.msk.bf16.vlgmr.msra.gmra.mxu1 %vm97_vm0, %v280_v47 }
 0x2c6   :  { %1954 = vmatpush3.bf16.msra.mxu1 %v2306_v6  ;;  %1957 = vmatprep.mubr.msk.bf16.mxu1 %vm2209_vm1, %v2208_v7 }
 0x2c7   :  { %1955 = vmatprep.subr.bf16.mxu1 %v2208_v7 }
 0x2ca   :  { %1956 = vmatpush3.bf16.msra.mxu1 %v2316_v8 }
 0x2cb   :  { %1969 = vmatprep.subr.bf16.mxu1 %v2208_v7 }
 0x385   :  { %v318_v50 = vpop.f32.mrf.mxu1 }
 0x386   :  { %v324_v51 = vadd.f32 %v318_v50, %v148_v49 }
 0x387   :  { %v1943_v52 = vpop.f32.mrf.mxu1 }
 0x388   :  { %2118 = vtanh.f32 %v324_v51  ;;  %v325_v56 = vmul.f32 0.5, %v324_v51 }
 0x389   :  { %v321_v53 = vpop.f32.mrf.mxu1 }
 0x38a   :  { %2120 = vtanh.f32 %v325_v56 }
 0x38b   :  { %v1944_v54 = vpop.f32.mrf.mxu1 }
 0x395   :  { %v2119_v55 = vpop.eup %2118 }
 0x396   :  { %332 = vrot.lane.b32.xlu1 %v2119_v55, %s2210_s5 }
 0x397   :  { %v2121_v57 = vpop.eup %2120 }
 0x398   :  { %v327_v58 = vmul.f32 0.5, %v2121_v57 }
 0x39a   :  { %v328_v59 = vadd.f32 0.5, %v327_v58 }
 0x39c   :  { %v330_v62 = vmul.f32 %v328_v59, %v262_v42 }
 0x408   :  { %v333_v60 = vpop.permute.xlu1 %332 }
 0x409   :  { %v335_v61 = vmul.f32 %v333_v60, %v328_v59 }
 0x40b   :  { %337 = vrot.lane.b32.xlu0 %v335_v61, %s2210_s5 }
 0x47d   :  { %v338_v63 = vpop.permute.xlu0 %337 }
 0x47e   :  { %v340_v0 = vadd.f32 %v338_v63, %v330_v62 }
 0x480   :  { %2122 = vtanh.f32 %v340_v0 }
 0x48d   :  { %v2123_v1 = vpop.eup %2122 }
 0x48e   :  { %343 = vrot.lane.b32.xlu1 %v2123_v1, %s2210_s5 }
 0x500   :  { %v344_v2 = vpop.permute.xlu1 %343 }
 0x501   :  { %v346_v3 = vmul.f32 %v344_v2, %v328_v59 }
 0x503   :  { %v2375_v4 = vpack.c.bf16 %v346_v3, %v346_v3 }
 0x505   :  { %356 = vrot.lane.b32.xlu0 %v2375_v4, %s2211_s27 }
 0x577   :  { %v357_v5 = vpop.permute.xlu0 %356 }
 0x578   :  { %1950 = vmatmul.mubr.msk.bf16.vlgmr.msra.gmra.mxu0 %vm97_vm0, %v357_v5 }
 0x579   :  { %1962 = vmatpush3.bf16.msra.mxu0 %v2306_v6  ;;  %1965 = vmatprep.mubr.msk.bf16.mxu0 %vm2209_vm1, %v2208_v7 }
 0x57a   :  { %1963 = vmatprep.subr.bf16.mxu0 %v2208_v7 }
 0x57d   :  { %1964 = vmatpush3.bf16.msra.mxu0 %v2316_v8 }
 0x57e   :  { %1977 = vmatprep.subr.bf16.mxu0 %v2208_v7 }
 0x638   :  { %v395_v9 = vpop.f32.mrf.mxu0 }
 0x639   :  { %v401_v10 = vadd.f32 %v395_v9, %v2342_v14 }
 0x63a   :  { %v1951_v11 = vpop.f32.mrf.mxu0 }
 0x63b   :  { %2124 = vtanh.f32 %v401_v10  ;;  %v402_v17 = vmul.f32 0.5, %v401_v10 }
 0x63c   :  { %v398_v12 = vpop.f32.mrf.mxu0 }
 0x63d   :  { %2126 = vtanh.f32 %v402_v17 }
 0x63e   :  { %v1952_v13 = vpop.f32.mrf.mxu0 }
 0x648   :  { %v2125_v16 = vpop.eup %2124 }
 0x649   :  { %409 = vrot.lane.b32.xlu1 %v2125_v16, %s2210_s5 }
 0x64a   :  { %v2127_v19 = vpop.eup %2126 }
 0x64b   :  { %v404_v20 = vmul.f32 0.5, %v2127_v19 }
 0x64d   :  { %v405_v23 = vadd.f32 0.5, %v404_v20 }
 0x64f   :  { %v407_v27 = vmul.f32 %v405_v23, %v340_v0 }
 0x6bb   :  { %v410_v24 = vpop.permute.xlu1 %409 }
 0x6bc   :  { %v412_v26 = vmul.f32 %v410_v24, %v405_v23 }
 0x6be   :  { %414 = vrot.lane.b32.xlu0 %v412_v26, %s2210_s5 }
 0x730   :  { %v415_v28 = vpop.permute.xlu0 %414 }
 0x731   :  { %v417_v29 = vadd.f32 %v415_v28, %v407_v27 }
 0x733   :  { %2128 = vtanh.f32 %v417_v29 }
 0x740   :  { %v2129_v14 = vpop.eup %2128 }
 0x741   :  { %420 = vrot.lane.b32.xlu1 %v2129_v14, %s2210_s5 }
 0x7b3   :  { %v421_v30 = vpop.permute.xlu1 %420 }
 0x7b4   :  { %v423_v31 = vmul.f32 %v421_v30, %v405_v23 }
 0x7b6   :  { %v2390_v32 = vpack.c.bf16 %v423_v31, %v423_v31 }
 0x7b8   :  { %433 = vrot.lane.b32.xlu0 %v2390_v32, %s2211_s27 }
 0x82a   :  { %v434_v33 = vpop.permute.xlu0 %433 }
 0x82b   :  { %1958 = vmatmul.mubr.msk.bf16.vlgmr.msra.gmra.mxu1 %vm97_vm0, %v434_v33 }
 0x82c   :  { %1970 = vmatpush3.bf16.msra.mxu1 %v2306_v6  ;;  %1973 = vmatprep.mubr.msk.bf16.mxu1 %vm2209_vm1, %v2208_v7 }
 0x82d   :  { %1971 = vmatprep.subr.bf16.mxu1 %v2208_v7 }
 0x830   :  { %1972 = vmatpush3.bf16.msra.mxu1 %v2316_v8 }
 0x831   :  { %1985 = vmatprep.subr.bf16.mxu1 %v2208_v7 }
 0x8eb   :  { %v472_v34 = vpop.f32.mrf.mxu1 }
 0x8ec   :  { %v478_v35 = vadd.f32 %v472_v34, %v2348_v21 }
 0x8ed   :  { %v1959_v36 = vpop.f32.mrf.mxu1 }
 0x8ee   :  { %2130 = vtanh.f32 %v478_v35  ;;  %v479_v40 = vmul.f32 0.5, %v478_v35 }
 0x8ef   :  { %v475_v37 = vpop.f32.mrf.mxu1 }
 0x8f0   :  { %2132 = vtanh.f32 %v479_v40 }
 0x8f1   :  { %v1960_v38 = vpop.f32.mrf.mxu1 }
 0x8fb   :  { %v2131_v39 = vpop.eup %2130 }
 0x8fc   :  { %486 = vrot.lane.b32.xlu1 %v2131_v39, %s2210_s5 }
 0x8fd   :  { %v2133_v41 = vpop.eup %2132 }
 0x8fe   :  { %v481_v42 = vmul.f32 0.5, %v2133_v41 }
 0x900   :  { %v482_v43 = vadd.f32 0.5, %v481_v42 }
 0x902   :  { %v484_v47 = vmul.f32 %v482_v43, %v417_v29 }
 0x96e   :  { %v487_v44 = vpop.permute.xlu1 %486 }
 0x96f   :  { %v489_v45 = vmul.f32 %v487_v44, %v482_v43 }
 0x971   :  { %491 = vrot.lane.b32.xlu0 %v489_v45, %s2210_s5 }
 0x9e3   :  { %v492_v48 = vpop.permute.xlu0 %491 }
 0x9e4   :  { %v494_v49 = vadd.f32 %v492_v48, %v484_v47 }
 0x9e6   :  { %2134 = vtanh.f32 %v494_v49 }
 0x9f3   :  { %v2135_v21 = vpop.eup %2134 }
 0x9f4   :  { %497 = vrot.lane.b32.xlu1 %v2135_v21, %s2210_s5 }
 0xa66   :  { %v498_v50 = vpop.permute.xlu1 %497 }
 0xa67   :  { %v500_v51 = vmul.f32 %v498_v50, %v482_v43 }
 0xa69   :  { %v2405_v52 = vpack.c.bf16 %v500_v51, %v500_v51 }
 0xa6b   :  { %510 = vrot.lane.b32.xlu0 %v2405_v52, %s2211_s27 }
 0xadd   :  { %v511_v53 = vpop.permute.xlu0 %510 }
 0xade   :  { %1966 = vmatmul.mubr.msk.bf16.vlgmr.msra.gmra.mxu0 %vm97_vm0, %v511_v53 }
 0xadf   :  { %1978 = vmatpush3.bf16.msra.mxu0 %v2306_v6  ;;  %1981 = vmatprep.mubr.msk.bf16.mxu0 %vm2209_vm1, %v2208_v7 }
 0xae0   :  { %1979 = vmatprep.subr.bf16.mxu0 %v2208_v7 }
 0xae3   :  { %1980 = vmatpush3.bf16.msra.mxu0 %v2316_v8 }
 0xb9e   :  { %v549_v54 = vpop.f32.mrf.mxu0 }
 0xb9f   :  { %v555_v55 = vadd.f32 %v549_v54, %v2346_v18 }
 0xba0   :  { %v1967_v56 = vpop.f32.mrf.mxu0 }
 0xba1   :  { %2136 = vtanh.f32 %v555_v55  ;;  %v556_v60 = vmul.f32 0.5, %v555_v55 }
 0xba2   :  { %v552_v57 = vpop.f32.mrf.mxu0 }
 0xba3   :  { %2138 = vtanh.f32 %v556_v60  ;;  %v2481_v60 = vld [vmem:[%s2734_s7] sm:$0xff]  }
 0xba4   :  { %v1968_v58 = vpop.f32.mrf.mxu0 }
 0xbae   :  { %v2137_v59 = vpop.eup %2136 }
 0xbaf   :  { %563 = vrot.lane.b32.xlu1 %v2137_v59, %s2210_s5 }
 0xbb0   :  { %v2139_v61 = vpop.eup %2138 }
 0xbb1   :  { %v558_v62 = vmul.f32 0.5, %v2139_v61  ;;  %v1803_v61 = vld [vmem:[%s2732_s2 + $0x8] sm:$0xff] }
 0xbb3   :  { %v559_v63 = vadd.f32 0.5, %v558_v62 }
 0xbb5   :  { %v561_v2 = vmul.f32 %v559_v63, %v494_v49 }
 0xc21   :  { %v564_v0 = vpop.permute.xlu1 %563 }
 0xc22   :  { %v566_v1 = vmul.f32 %v564_v0, %v559_v63 }
 0xc24   :  { %568 = vrot.lane.b32.xlu0 %v566_v1, %s2210_s5 }
 0xc96   :  { %v569_v3 = vpop.permute.xlu0 %568 }
 0xc97   :  { %v571_v5 = vadd.f32 %v569_v3, %v561_v2 }
 0xc99   :  { %2140 = vtanh.f32 %v571_v5 }
 0xca6   :  { %v2141_v18 = vpop.eup %2140 }
 0xca7   :  { %574 = vrot.lane.b32.xlu1 %v2141_v18, %s2210_s5 }
 0xd19   :  { %v575_v9 = vpop.permute.xlu1 %574 }
 0xd1a   :  { %v577_v10 = vmul.f32 %v575_v9, %v559_v63  ;;  %v1802_v63 = vld [vmem:[%s2730_s1 + $0x8] sm:$0xff] }
 0xd1b   :  { %v972_v0 = vpack.c.bf16 %v1802_v63, %v1802_v63 }
 0xd1c   :  { %v2419_v11 = vpack.c.bf16 %v577_v10, %v577_v10  ;;  %v2512_v10 = vld [vmem:[%s2735_s8] ss:$0 sm:$0xff] }
 0xd1e   :  { %587 = vrot.lane.b32.xlu0 %v2419_v11, %s2211_s27 }
 0xd90   :  { %v588_v12 = vpop.permute.xlu0 %587 }
 0xd91   :  { %1974 = vmatmul.mubr.msk.bf16.vlgmr.msra.gmra.mxu1 %vm97_vm0, %v588_v12 }
 0xd92   :  { %1986 = vmatpush3.bf16.msra.mxu1 %v2306_v6  ;;  %1989 = vmatprep.mubr.msk.bf16.mxu1 %vm2209_vm1, %v2208_v7 }
 0xd93   :  { %1987 = vmatprep.subr.bf16.mxu1 %v2208_v7 }
 0xd96   :  { %1988 = vmatpush3.bf16.msra.mxu1 %v2316_v8 }
 0xd97   :  { %2005 = vmatprep.subr.bf16.mxu1 %v2208_v7 }
 0xe51   :  { %v626_v13 = vpop.f32.mrf.mxu1 }
 0xe52   :  { %v632_v16 = vadd.f32 %v626_v13, %v2352_v25 }
 0xe53   :  { %v1975_v17 = vpop.f32.mrf.mxu1 }
 0xe54   :  { %2142 = vtanh.f32 %v632_v16  ;;  %v633_v6 = vmul.f32 0.5, %v632_v16 }
 0xe55   :  { %v629_v19 = vpop.f32.mrf.mxu1 }
 0xe56   :  { %2144 = vtanh.f32 %v633_v6 }
 0xe57   :  { %v1976_v20 = vpop.f32.mrf.mxu1 }
 0xe61   :  { %v2143_v23 = vpop.eup %2142 }
 0xe62   :  { %640 = vrot.lane.b32.xlu1 %v2143_v23, %s2210_s5 }
 0xe63   :  { %v2145_v24 = vpop.eup %2144 }
 0xe64   :  { %v635_v26 = vmul.f32 0.5, %v2145_v24 }
 0xe66   :  { %v636_v27 = vadd.f32 0.5, %v635_v26 }
 0xe68   :  { %v638_v8 = vmul.f32 %v636_v27, %v571_v5 }
 0xed4   :  { %v641_v28 = vpop.permute.xlu1 %640 }
 0xed5   :  { %v643_v29 = vmul.f32 %v641_v28, %v636_v27 }
 0xed7   :  { %645 = vrot.lane.b32.xlu0 %v643_v29, %s2210_s5 }
 0xf49   :  { %v646_v14 = vpop.permute.xlu0 %645 }
 0xf4a   :  { %v648_v30 = vadd.f32 %v646_v14, %v638_v8 }
 0xf4c   :  { %2146 = vtanh.f32 %v648_v30 }
 0xf59   :  { %v2147_v25 = vpop.eup %2146 }
 0xf5a   :  { %651 = vrot.lane.b32.xlu1 %v2147_v25, %s2210_s5 }
 0xfcc   :  { %v652_v31 = vpop.permute.xlu1 %651 }
 0xfcd   :  { %v654_v33 = vmul.f32 %v652_v31, %v636_v27 }
 0xfcf   :  { %v2434_v34 = vpack.c.bf16 %v654_v33, %v654_v33 }
 0xfd1   :  { %664 = vrot.lane.b32.xlu0 %v2434_v34, %s2211_s27 }
0x1043   :  { %v665_v35 = vpop.permute.xlu0 %664 }
0x1044   :  { %1982 = vmatmul.mubr.msk.bf16.vlgmr.msra.gmra.mxu0 %vm97_vm0, %v665_v35 }
0x1104   :  { %v703_v36 = vpop.f32.mrf.mxu0 }
0x1105   :  { %v709_v37 = vadd.f32 %v703_v36, %v2344_v15 }
0x1106   :  { %v1983_v38 = vpop.f32.mrf.mxu0 }
0x1107   :  { %2148 = vtanh.f32 %v709_v37  ;;  %v710_v42 = vmul.f32 0.5, %v709_v37 }
0x1108   :  { %v706_v39 = vpop.f32.mrf.mxu0 }
0x1109   :  { %2150 = vtanh.f32 %v710_v42 }
0x110a   :  { %v1984_v40 = vpop.f32.mrf.mxu0 }
0x1114   :  { %v2149_v41 = vpop.eup %2148 }
0x1115   :  { %717 = vrot.lane.b32.xlu1 %v2149_v41, %s2210_s5 }
0x1116   :  { %v2151_v43 = vpop.eup %2150 }
0x1117   :  { %v712_v44 = vmul.f32 0.5, %v2151_v43 }
0x1119   :  { %v713_v45 = vadd.f32 0.5, %v712_v44 }
0x111b   :  { %v715_v15 = vmul.f32 %v713_v45, %v648_v30 }
0x1187   :  { %v718_v47 = vpop.permute.xlu1 %717 }
0x1188   :  { %v720_v48 = vmul.f32 %v718_v47, %v713_v45 }
0x118a   :  { %722 = vrot.lane.b32.xlu0 %v720_v48, %s2210_s5 }
0x118e   :  { %273 = vrot.lane.b32.xlu0 %v2361_v46, %s2211_s27  ;;  %v2098_v46 = vld [vmem:[%s2733_s6 + $0x8] sm:$0xff]  }
0x118f   :  { %1993 = vmatprep.subr.bf16.mxu0 %v2098_v46 }
0x1190   :  { %1994 = vmatpush3.bf16.msra.mxu0 %v2098_v46 }
0x1192   :  { %428 = vrot.lane.b32.xlu0 %v2390_v32, %s2211_s27  ;;  %v2099_v32 = vld [vmem:[%s2733_s6] sm:$0xff]  }
0x1193   :  { %1995 = vmatprep.subr.bf16.mxu0 %v2099_v32 }
0x1194   :  { %1996 = vmatpush3.bf16.msra.mxu0 %v2099_v32 }
0x1195   :  { %2021 = vmatprep.subr.bf16.mxu0 %v2208_v7 }
0x11fc   :  { %v723_v49 = vpop.permute.xlu0 %722 }
0x11fd   :  { %v2446_v21 = vadd.f32 %v723_v49, %v715_v15 }
0x11ff   :  { %2152 = vtanh.f32 %v2446_v21 }
0x1200   :  { %v274_v50 = vpop.permute.xlu0 %273 }
0x1201   :  { %277 = vst.msk [vmem:[#allocation2] sm:$0xf] %vm276_vm2, %v274_v50 }
0x1204   :  { %v429_v51 = vpop.permute.xlu0 %428 }
0x1205   :  { %431 = vst.msk [vmem:[#allocation2 + $0x8] sm:$0xf] %vm276_vm2, %v429_v51 }
0x120c   :  { %v2153_v53 = vpop.eup %2152 }
0x120d   :  { %728 = vrot.lane.b32.xlu1 %v2153_v53, %s2210_s5 }
0x1211   :  { %351 = vrot.lane.b32.xlu1 %v2375_v4, %s2211_s27 }
0x1215   :  { %505 = vrot.lane.b32.xlu1 %v2405_v52, %s2211_s27  ;;  %v2473_v52 = vld [vmem:[%s2734_s7 + $0x8] sm:$0xff]  }
0x127f   :  { %v729_v54 = vpop.permute.xlu1 %728 }
0x1280   :  { %v731_v55 = vmul.f32 %v729_v54, %v713_v45 }
0x1282   :  { %v2463_v56 = vpack.c.bf16 %v731_v55, %v731_v55 }
0x1283   :  { %v352_v57 = vpop.permute.xlu1 %351 }
0x1284   :  { %354 = vst.msk [vmem:[#allocation2 + $0x4] sm:$0xf] %vm276_vm2, %v352_v57  ;;  %741 = vrot.lane.b32.xlu0 %v2463_v56, %s2211_s27 }
0x1287   :  { %v506_v58 = vpop.permute.xlu1 %505 }
0x1288   :  { %508 = vst.msk [vmem:[#allocation2 + $0xc] sm:$0xf] %vm276_vm2, %v506_v58  ;;  %1035 = vrot.lane.b32.xlu0 %v1803_v61, %s2210_s5 }
0x128b   :  { %v2100_v59 = vld [vmem:[#allocation2] sm:$0xff]  }
0x128c   :  { %1997 = vmatprep.mubr.msk.bf16.mxu0 %vm97_vm0, %v2100_v59 }
0x128f   :  { %v2101_v4 = vld [vmem:[#allocation2 + $0x8] sm:$0xff]  }
0x1290   :  { %1998 = vmatmul.mubr.msk.bf16.vlgmr.msra.gmra.mxu0 %vm97_vm0, %v2101_v4 }
0x1291   :  { %2022 = vmatpush3.bf16.msra.mxu0 %v2473_v52 }
0x1292   :  { %2023 = vmatprep.subr.bf16.mxu0 %v2208_v7 }
0x1295   :  { %2024 = vmatpush3.bf16.msra.mxu0 %v2481_v60 }
0x1296   :  { %2037 = vmatprep.subr.bf16.mxu0 %v2208_v7 }
0x12f6   :  { %v742_v62 = vpop.permute.xlu0 %741 }
0x12f7   :  { %1990 = vmatmul.mubr.msk.bf16.vlgmr.msra.gmra.mxu1 %vm97_vm0, %v742_v62 }
0x12f8   :  { %2006 = vmatpush3.bf16.msra.mxu1 %v2473_v52  ;;  %2009 = vmatprep.mubr.msk.bf16.mxu1 %vm2209_vm1, %v2208_v7 }
0x12f9   :  { %2007 = vmatprep.subr.bf16.mxu1 %v2208_v7 }
0x12fa   :  { %v1036_v8 = vpop.permute.xlu0 %1035 }
0x12fc   :  { %2008 = vmatpush3.bf16.msra.mxu1 %v2481_v60 }
0x12fd   :  { %2013 = vmatprep.subr.bf16.mxu1 %v2208_v7 }
0x12ff   :  { %2010 = vmatmul.mubr.msk.bf16.vlgmr.msra.gmra.mxu1 %vm97_vm0, %v972_v0 }
0x1300   :  { %2014 = vmatpush3.bf16.msra.mxu1 %v2473_v52  ;;  %2017 = vmatprep.mubr.msk.bf16.mxu1 %vm2209_vm1, %v2208_v7 }
0x1301   :  { %2015 = vmatprep.subr.bf16.mxu1 %v2208_v7 }
0x1304   :  { %2016 = vmatpush3.bf16.msra.mxu1 %v2481_v60 }
0x1305   :  { %2029 = vmatprep.subr.bf16.mxu1 %v2208_v7 }
0x1350   :  { %v2506_v1 = vpop.f32.mrf.mxu0 }
0x1352   :  { %v928_v18 = vpop.f32.mrf.mxu0 }
0x1353   :  { %v929_v13 = vadd.f32 %v2512_v10, %v928_v18 }
0x1354   :  { %v2542_v51 = vpop.f32.mrf.mxu0 }
0x1356   :  { %v931_v46 = vpop.f32.mrf.mxu0 }
0x1357   :  { %v932_v32 = vadd.f32 %v2512_v10, %v931_v46 }
0x13b7   :  { %v780_v2 = vpop.f32.mrf.mxu1 }
0x13b8   :  { %v786_v3 = vadd.f32 %v780_v2, %v2350_v22 }
0x13b9   :  { %v1991_v5 = vpop.f32.mrf.mxu1 }
0x13ba   :  { %v787_v35 = vmul.f32 0.5, %v786_v3 }
0x13bb   :  { %v783_v9 = vpop.f32.mrf.mxu1 }
0x13bd   :  { %v1992_v12 = vpop.f32.mrf.mxu1 }
0x13bf   :  { %v1022_v16 = vpop.f32.mrf.mxu1 }
0x13c0   :  { %v1028_v17 = vadd.f32 %v1022_v16, %v929_v13 }
0x13c1   :  { %v2011_v19 = vpop.f32.mrf.mxu1 }
0x13c2   :  { %2154 = vtanh.f32 %v1028_v17  ;;  %v1029_v22 = vmul.f32 0.5, %v1028_v17 }
0x13c3   :  { %v1025_v20 = vpop.f32.mrf.mxu1 }
0x13c4   :  { %2156 = vtanh.f32 %v1029_v22 }
0x13c5   :  { %v2012_v23 = vpop.f32.mrf.mxu1 }
0x13cf   :  { %v2155_v6 = vpop.eup %2154 }
0x13d0   :  { %1040 = vrot.lane.b32.xlu1 %v2155_v6, %s2210_s5 }
0x13d1   :  { %v2157_v24 = vpop.eup %2156 }
0x13d2   :  { %v1031_v26 = vmul.f32 0.5, %v2157_v24 }
0x13d4   :  { %v1032_v27 = vadd.f32 0.5, %v1031_v26 }
0x13d6   :  { %v1038_v14 = vmul.f32 %v1036_v8, %v1032_v27 }
0x1442   :  { %v1041_v28 = vpop.permute.xlu1 %1040 }
0x1443   :  { %v1043_v29 = vmul.f32 %v1041_v28, %v1032_v27 }
0x1445   :  { %1045 = vrot.lane.b32.xlu1 %v1043_v29, %s2210_s5 }
0x14b7   :  { %v1046_v30 = vpop.permute.xlu1 %1045 }
0x14b8   :  { %v1048_v25 = vadd.f32 %v1046_v30, %v1038_v14 }
0x14ba   :  { %2158 = vtanh.f32 %v1048_v25 }
0x14bb   :  { %2160 = vtanh.f32 %v786_v3 }
0x14bc   :  { %2162 = vtanh.f32 %v787_v35 }
0x14c7   :  { %v2159_v31 = vpop.eup %2158 }
0x14c8   :  { %1051 = vrot.lane.b32.xlu0 %v2159_v31, %s2210_s5  ;;  %v2161_v33 = vpop.eup %2160 }
0x14c9   :  { %v2163_v36 = vpop.eup %2162 }
0x14ca   :  { %v789_v37 = vmul.f32 0.5, %v2163_v36 }
0x14cc   :  { %794 = vrot.lane.b32.xlu0 %v2161_v33, %s2210_s5  ;;  %v790_v41 = vadd.f32 0.5, %v789_v37 }
0x14ce   :  { %v792_v45 = vmul.f32 %v790_v41, %v2446_v21 }
0x153a   :  { %v1052_v38 = vpop.permute.xlu0 %1051 }
0x153b   :  { %v1054_v39 = vmul.f32 %v1052_v38, %v1032_v27  ;;  %v937_v27 = vadd.f32 %v2506_v1, %v2512_v10 }
0x153d   :  { %v2519_v40 = vpack.c.bf16 %v1054_v39, %v1054_v39 }
0x153e   :  { %v795_v42 = vpop.permute.xlu0 %794 }
0x153f   :  { %v797_v43 = vmul.f32 %v795_v42, %v790_v41  ;;  %1064 = vrot.lane.b32.xlu1 %v2519_v40, %s2211_s27 }
0x1541   :  { %799 = vrot.lane.b32.xlu0 %v797_v43, %s2210_s5 }
0x15b1   :  { %v1065_v44 = vpop.permute.xlu1 %1064 }
0x15b2   :  { %2018 = vmatmul.mubr.msk.bf16.vlgmr.msra.gmra.mxu1 %vm97_vm0, %v1065_v44 }
0x15b3   :  { %v800_v47 = vpop.permute.xlu0 %799  ;;  %2030 = vmatpush3.bf16.msra.mxu1 %v2473_v52  ;;  %2033 = vmatprep.mubr.msk.bf16.mxu1 %vm2209_vm1, %v2208_v7 }
0x15b4   :  { %v2529_v48 = vadd.f32 %v800_v47, %v792_v45  ;;  %2031 = vmatprep.subr.bf16.mxu1 %v2208_v7 }
0x15b6   :  { %2164 = vtanh.f32 %v2529_v48 }
0x15b7   :  { %2032 = vmatpush3.bf16.msra.mxu1 %v2481_v60 }
0x15b8   :  { %2045 = vmatprep.subr.bf16.mxu1 %v2208_v7 }
0x15c3   :  { %v2165_v15 = vpop.eup %2164 }
0x15c4   :  { %805 = vrot.lane.b32.xlu0 %v2165_v15, %s2210_s5  ;;  %v940_v15 = vadd.f32 %v2542_v51, %v2512_v10 }
0x15c8   :  { %582 = vrot.lane.b32.xlu0 %v2419_v11, %s2211_s27 }
0x15cc   :  { %736 = vrot.lane.b32.xlu0 %v2463_v56, %s2211_s27 }
0x1636   :  { %v806_v49 = vpop.permute.xlu0 %805 }
0x1637   :  { %v2548_v18 = vmul.f32 %v806_v49, %v790_v41 }
0x1639   :  { %v1842_v9 = vpack.c.bf16 %v2548_v18, %v2548_v18 }
0x163a   :  { %v583_v21 = vpop.permute.xlu0 %582 }
0x163b   :  { %585 = vst.msk [vmem:[#allocation2 + $0x10] sm:$0xf] %vm276_vm2, %v583_v21 }
0x163e   :  { %v737_v50 = vpop.permute.xlu0 %736 }
0x163f   :  { %739 = vst.msk [vmem:[#allocation2 + $0x18] sm:$0xf] %vm276_vm2, %v737_v50 }
0x1672   :  { %v1103_v53 = vpop.f32.mrf.mxu1 }
0x1673   :  { %v1109_v54 = vadd.f32 %v1103_v53, %v932_v32 }
0x1674   :  { %v2019_v55 = vpop.f32.mrf.mxu1 }
0x1675   :  { %2166 = vtanh.f32 %v1109_v54  ;;  %v1110_v56 = vmul.f32 0.5, %v1109_v54 }
0x1676   :  { %v1106_v11 = vpop.f32.mrf.mxu1 }
0x1677   :  { %2168 = vtanh.f32 %v1110_v56 }
0x1678   :  { %v2020_v57 = vpop.f32.mrf.mxu1 }
0x1682   :  { %v2167_v58 = vpop.eup %2166 }
0x1683   :  { %1117 = vrot.lane.b32.xlu1 %v2167_v58, %s2210_s5 }
0x1684   :  { %v2169_v59 = vpop.eup %2168 }
0x1685   :  { %v1112_v4 = vmul.f32 0.5, %v2169_v59 }
0x1687   :  { %v1113_v61 = vadd.f32 0.5, %v1112_v4 }
0x1689   :  { %v1115_v0 = vmul.f32 %v1113_v61, %v1048_v25 }
0x16f5   :  { %v1118_v62 = vpop.permute.xlu1 %1117 }
0x16f6   :  { %v1120_v63 = vmul.f32 %v1118_v62, %v1113_v61 }
0x16f8   :  { %1122 = vrot.lane.b32.xlu1 %v1120_v63, %s2210_s5 }
0x176a   :  { %v1123_v2 = vpop.permute.xlu1 %1122 }
0x176b   :  { %v1125_v3 = vadd.f32 %v1123_v2, %v1115_v0 }
0x176d   :  { %2170 = vtanh.f32 %v1125_v3 }
0x177a   :  { %v2171_v5 = vpop.eup %2170 }
0x177b   :  { %1128 = vrot.lane.b32.xlu1 %v2171_v5, %s2210_s5 }
0x177f   :  { %659 = vrot.lane.b32.xlu1 %v2434_v34, %s2211_s27 }
0x1783   :  { %813 = vrot.lane.b32.xlu1 %v1842_v9, %s2211_s27 }
0x17ed   :  { %v1129_v12 = vpop.permute.xlu1 %1128 }
0x17ee   :  { %v1131_v13 = vmul.f32 %v1129_v12, %v1113_v61 }
0x17f0   :  { %v2555_v16 = vpack.c.bf16 %v1131_v13, %v1131_v13 }
0x17f1   :  { %v660_v17 = vpop.permute.xlu1 %659 }
0x17f2   :  { %662 = vst.msk [vmem:[#allocation2 + $0x14] sm:$0xf] %vm276_vm2, %v660_v17  ;;  %1141 = vrot.lane.b32.xlu0 %v2555_v16, %s2211_s27 }
0x17f5   :  { %v814_v19 = vpop.permute.xlu1 %813 }
0x17f6   :  { %816 = vst.msk [vmem:[#allocation2 + $0x1c] sm:$0xf] %vm276_vm2, %v814_v19 }
0x17f9   :  { %v2104_v20 = vld [vmem:[#allocation2 + $0x10] sm:$0xff]  }
0x17fa   :  { %2001 = vmatprep.mubr.msk.bf16.mxu0 %vm97_vm0, %v2104_v20 }
0x17fd   :  { %v2105_v34 = vld [vmem:[#allocation2 + $0x18] sm:$0xff]  }
0x17fe   :  { %2002 = vmatmul.mubr.msk.bf16.gmra.mxu0 %vm97_vm0, %v2105_v34 }
0x17ff   :  { %2025 = vmatprep.mubr.msk.bf16.mxu0 %vm2209_vm1, %v2208_v7 }
0x1864   :  { %v1142_v23 = vpop.permute.xlu0 %1141 }
0x1865   :  { %2026 = vmatmul.mubr.msk.bf16.vlgmr.msra.gmra.mxu0 %vm97_vm0, %v1142_v23 }
0x1866   :  { %2038 = vmatpush3.bf16.msra.mxu0 %v2473_v52  ;;  %2041 = vmatprep.mubr.msk.bf16.mxu0 %vm2209_vm1, %v2208_v7 }
0x1867   :  { %2039 = vmatprep.subr.bf16.mxu0 %v2208_v7 }
0x186a   :  { %2040 = vmatpush3.bf16.msra.mxu0 %v2481_v60 }
0x186b   :  { %2053 = vmatprep.subr.bf16.mxu0 %v2208_v7 }
0x18be   :  { %v2572_v6 = vpop.f32.mrf.mxu0 }
0x18c0   :  { %v2574_v22 = vpop.f32.mrf.mxu0 }
0x18c2   :  { %v2576_v24 = vpop.f32.mrf.mxu0 }
0x18c4   :  { %v2578_v26 = vpop.f32.mrf.mxu0 }
0x1925   :  { %v1180_v28 = vpop.f32.mrf.mxu0 }
0x1926   :  { %v1186_v29 = vadd.f32 %v1180_v28, %v937_v27 }
0x1927   :  { %v2027_v8 = vpop.f32.mrf.mxu0 }
0x1928   :  { %2172 = vtanh.f32 %v1186_v29  ;;  %v1187_v31 = vmul.f32 0.5, %v1186_v29 }
0x1929   :  { %v1183_v14 = vpop.f32.mrf.mxu0 }
0x192a   :  { %2174 = vtanh.f32 %v1187_v31 }
0x192b   :  { %v2028_v30 = vpop.f32.mrf.mxu0 }
0x1935   :  { %v2173_v25 = vpop.eup %2172 }
0x1936   :  { %1194 = vrot.lane.b32.xlu1 %v2173_v25, %s2210_s5 }
0x1937   :  { %v2175_v33 = vpop.eup %2174 }
0x1938   :  { %v1189_v35 = vmul.f32 0.5, %v2175_v33 }
0x193a   :  { %v1190_v36 = vadd.f32 0.5, %v1189_v35 }
0x193c   :  { %v1192_v39 = vmul.f32 %v1190_v36, %v1125_v3  ;;  %v945_v3 = vadd.f32 %v2512_v10, %v2574_v22 }
0x19a8   :  { %v1195_v37 = vpop.permute.xlu1 %1194 }
0x19a9   :  { %v1197_v38 = vmul.f32 %v1195_v37, %v1190_v36 }
0x19ab   :  { %1199 = vrot.lane.b32.xlu0 %v1197_v38, %s2210_s5 }
0x1a1d   :  { %v1200_v1 = vpop.permute.xlu0 %1199 }
0x1a1e   :  { %v1202_v41 = vadd.f32 %v1200_v1, %v1192_v39 }
0x1a20   :  { %2176 = vtanh.f32 %v1202_v41 }
0x1a2d   :  { %v2177_v42 = vpop.eup %2176 }
0x1a2e   :  { %1205 = vrot.lane.b32.xlu1 %v2177_v42, %s2210_s5 }
0x1aa0   :  { %v1206_v43 = vpop.permute.xlu1 %1205 }
0x1aa1   :  { %v1208_v44 = vmul.f32 %v1206_v43, %v1190_v36  ;;  %v948_v36 = vadd.f32 %v2512_v10, %v2578_v26 }
0x1aa3   :  { %v2585_v45 = vpack.c.bf16 %v1208_v44, %v1208_v44 }
0x1aa5   :  { %1218 = vrot.lane.b32.xlu0 %v2585_v45, %s2211_s27 }
0x1b17   :  { %v1219_v47 = vpop.permute.xlu0 %1218 }
0x1b18   :  { %2034 = vmatmul.mubr.msk.bf16.vlgmr.msra.gmra.mxu1 %vm97_vm0, %v1219_v47 }
0x1b19   :  { %2046 = vmatpush3.bf16.msra.mxu1 %v2473_v52  ;;  %2049 = vmatprep.mubr.msk.bf16.mxu1 %vm2209_vm1, %v2208_v7 }
0x1b1a   :  { %2047 = vmatprep.subr.bf16.mxu1 %v2208_v7 }
0x1b1d   :  { %2048 = vmatpush3.bf16.msra.mxu1 %v2481_v60 }
0x1b1e   :  { %2061 = vmatprep.subr.bf16.mxu1 %v2208_v7 }
0x1bd8   :  { %v1257_v49 = vpop.f32.mrf.mxu1 }
0x1bd9   :  { %v1263_v21 = vadd.f32 %v1257_v49, %v940_v15 }
0x1bda   :  { %v2035_v50 = vpop.f32.mrf.mxu1 }
0x1bdb   :  { %2178 = vtanh.f32 %v1263_v21  ;;  %v1264_v54 = vmul.f32 0.5, %v1263_v21 }
0x1bdc   :  { %v1260_v46 = vpop.f32.mrf.mxu1 }
0x1bdd   :  { %2180 = vtanh.f32 %v1264_v54  ;;  %v953_v54 = vadd.f32 %v2572_v6, %v2512_v10 }
0x1bde   :  { %v2036_v32 = vpop.f32.mrf.mxu1 }
0x1be8   :  { %v2179_v53 = vpop.eup %2178 }
0x1be9   :  { %1271 = vrot.lane.b32.xlu1 %v2179_v53, %s2210_s5 }
0x1bea   :  { %v2181_v55 = vpop.eup %2180 }
0x1beb   :  { %v1266_v11 = vmul.f32 0.5, %v2181_v55 }
0x1bed   :  { %v1267_v57 = vadd.f32 0.5, %v1266_v11 }
0x1bef   :  { %v1269_v59 = vmul.f32 %v1267_v57, %v1202_v41 }
0x1c5b   :  { %v1272_v58 = vpop.permute.xlu1 %1271 }
0x1c5c   :  { %v1274_v56 = vmul.f32 %v1272_v58, %v1267_v57 }
0x1c5e   :  { %1276 = vrot.lane.b32.xlu0 %v1274_v56, %s2210_s5 }
0x1cd0   :  { %v1277_v51 = vpop.permute.xlu0 %1276 }
0x1cd1   :  { %v1279_v4 = vadd.f32 %v1277_v51, %v1269_v59 }
0x1cd3   :  { %2182 = vtanh.f32 %v1279_v4 }
0x1ce0   :  { %v2183_v61 = vpop.eup %2182 }
0x1ce1   :  { %1282 = vrot.lane.b32.xlu1 %v2183_v61, %s2210_s5 }
0x1d53   :  { %v1283_v62 = vpop.permute.xlu1 %1282 }
0x1d54   :  { %v1285_v63 = vmul.f32 %v1283_v62, %v1267_v57 }
0x1d56   :  { %v2601_v0 = vpack.c.bf16 %v1285_v63, %v1285_v63 }
0x1d58   :  { %1295 = vrot.lane.b32.xlu0 %v2601_v0, %s2211_s27 }
0x1dca   :  { %v1296_v2 = vpop.permute.xlu0 %1295 }
0x1dcb   :  { %2042 = vmatmul.mubr.msk.bf16.vlgmr.msra.gmra.mxu0 %vm97_vm0, %v1296_v2 }
0x1dcc   :  { %2054 = vmatpush3.bf16.msra.mxu0 %v2473_v52  ;;  %2057 = vmatprep.mubr.msk.bf16.mxu0 %vm2209_vm1, %v2208_v7 }
0x1dcd   :  { %2055 = vmatprep.subr.bf16.mxu0 %v2208_v7 }
0x1dd0   :  { %2056 = vmatpush3.bf16.msra.mxu0 %v2481_v60 }
0x1e8b   :  { %v1334_v5 = vpop.f32.mrf.mxu0 }
0x1e8c   :  { %v1340_v9 = vadd.f32 %v1334_v5, %v945_v3 }
0x1e8d   :  { %v2043_v12 = vpop.f32.mrf.mxu0 }
0x1e8e   :  { %2184 = vtanh.f32 %v1340_v9  ;;  %v1341_v20 = vmul.f32 0.5, %v1340_v9 }
0x1e8f   :  { %v1337_v13 = vpop.f32.mrf.mxu0 }
0x1e90   :  { %2186 = vtanh.f32 %v1341_v20  ;;  %v956_v20 = vadd.f32 %v2576_v24, %v2512_v10 }
0x1e91   :  { %v2044_v17 = vpop.f32.mrf.mxu0 }
0x1e9b   :  { %v2185_v19 = vpop.eup %2184 }
0x1e9c   :  { %1348 = vrot.lane.b32.xlu1 %v2185_v19, %s2210_s5 }
0x1e9d   :  { %v2187_v34 = vpop.eup %2186 }
0x1e9e   :  { %v1343_v23 = vmul.f32 0.5, %v2187_v34 }
0x1ea0   :  { %v1344_v27 = vadd.f32 0.5, %v1343_v23 }
0x1ea2   :  { %v1346_v8 = vmul.f32 %v1344_v27, %v1279_v4 }
0x1f0e   :  { %v1349_v28 = vpop.permute.xlu1 %1348 }
0x1f0f   :  { %v1351_v29 = vmul.f32 %v1349_v28, %v1344_v27 }
0x1f11   :  { %1353 = vrot.lane.b32.xlu0 %v1351_v29, %s2210_s5 }
0x1f83   :  { %v1354_v22 = vpop.permute.xlu0 %1353 }
0x1f84   :  { %v1356_v14 = vadd.f32 %v1354_v22, %v1346_v8 }
0x1f86   :  { %2188 = vtanh.f32 %v1356_v14 }
0x1f93   :  { %v2189_v30 = vpop.eup %2188 }
0x1f94   :  { %1359 = vrot.lane.b32.xlu1 %v2189_v30, %s2210_s5 }
0x2006   :  { %v1360_v25 = vpop.permute.xlu1 %1359 }
0x2007   :  { %v1362_v31 = vmul.f32 %v1360_v25, %v1344_v27 }
0x2009   :  { %v2616_v33 = vpack.c.bf16 %v1362_v31, %v1362_v31 }
0x200b   :  { %1372 = vrot.lane.b32.xlu0 %v2616_v33, %s2211_s27 }
0x207d   :  { %v1373_v35 = vpop.permute.xlu0 %1372 }
0x207e   :  { %2050 = vmatmul.mubr.msk.bf16.vlgmr.msra.gmra.mxu1 %vm97_vm0, %v1373_v35 }
0x207f   :  { %2062 = vmatpush3.bf16.msra.mxu1 %v2473_v52  ;;  %2065 = vmatprep.mubr.msk.bf16.mxu1 %vm2209_vm1, %v2208_v7 }
0x2080   :  { %2063 = vmatprep.subr.bf16.mxu1 %v2208_v7 }
0x2083   :  { %2064 = vmatpush3.bf16.msra.mxu1 %v2481_v60 }
0x213e   :  { %v1411_v37 = vpop.f32.mrf.mxu1 }
0x213f   :  { %v1417_v38 = vadd.f32 %v1411_v37, %v948_v36 }
0x2140   :  { %v2051_v39 = vpop.f32.mrf.mxu1 }
0x2141   :  { %2190 = vtanh.f32 %v1417_v38  ;;  %v1418_v52 = vmul.f32 0.5, %v1417_v38  ;;  %v2107_v39 = vld [vmem:[%s2736_s9] sm:$0xff]  }
0x2142   :  { %v1414_v1 = vpop.f32.mrf.mxu1 }
0x2143   :  { %2192 = vtanh.f32 %v1418_v52 }
0x2144   :  { %v2052_v41 = vpop.f32.mrf.mxu1 }
0x214e   :  { %v2191_v42 = vpop.eup %2190 }
0x214f   :  { %1425 = vrot.lane.b32.xlu1 %v2191_v42, %s2210_s5 }
0x2150   :  { %v2193_v43 = vpop.eup %2192 }
0x2151   :  { %v1420_v44 = vmul.f32 0.5, %v2193_v43 }
0x2153   :  { %v1421_v47 = vadd.f32 0.5, %v1420_v44 }
0x2155   :  { %v1423_v60 = vmul.f32 %v1421_v47, %v1356_v14 }
0x21c1   :  { %v1426_v7 = vpop.permute.xlu1 %1425 }
0x21c2   :  { %v1428_v15 = vmul.f32 %v1426_v7, %v1421_v47 }
0x21c4   :  { %1430 = vrot.lane.b32.xlu0 %v1428_v15, %s2210_s5 }
0x2236   :  { %v1431_v26 = vpop.permute.xlu0 %1430 }
0x2237   :  { %v1433_v49 = vadd.f32 %v1431_v26, %v1423_v60 }
0x2239   :  { %2194 = vtanh.f32 %v1433_v49 }
0x2246   :  { %v2195_v21 = vpop.eup %2194 }
0x2247   :  { %1436 = vrot.lane.b32.xlu1 %v2195_v21, %s2210_s5  ;;  %v1824_v21 = vld [vmem:[%s2739_s10] ss:$0 sm:$0xff] }
0x22b9   :  { %v1437_v50 = vpop.permute.xlu1 %1436 }
0x22ba   :  { %v1439_v46 = vmul.f32 %v1437_v50, %v1421_v47 }
0x22bc   :  { %v2631_v32 = vpack.c.bf16 %v1439_v46, %v1439_v46 }
0x22be   :  { %1449 = vrot.lane.b32.xlu0 %v2631_v32, %s2211_s27 }
0x2330   :  { %v1450_v53 = vpop.permute.xlu0 %1449 }
0x2331   :  { %2058 = vmatmul.mubr.msk.bf16.vlgmr.msra.gmra.mxu0 %vm97_vm0, %v1450_v53 }
0x23f1   :  { %v1488_v55 = vpop.f32.mrf.mxu0 }
0x23f2   :  { %v1494_v11 = vadd.f32 %v1488_v55, %v953_v54 }
0x23f3   :  { %v2059_v57 = vpop.f32.mrf.mxu0 }
0x23f4   :  { %2196 = vtanh.f32 %v1494_v11  ;;  %v1495_v51 = vmul.f32 0.5, %v1494_v11 }
0x23f5   :  { %v1491_v58 = vpop.f32.mrf.mxu0 }
0x23f6   :  { %2198 = vtanh.f32 %v1495_v51 }
0x23f7   :  { %v2060_v56 = vpop.f32.mrf.mxu0 }
0x2401   :  { %v2197_v59 = vpop.eup %2196 }
0x2402   :  { %1502 = vrot.lane.b32.xlu1 %v2197_v59, %s2210_s5 }
0x2403   :  { %v2199_v4 = vpop.eup %2198 }
0x2404   :  { %v1497_v61 = vmul.f32 0.5, %v2199_v4 }
0x2406   :  { %v1498_v62 = vadd.f32 0.5, %v1497_v61 }
0x2408   :  { %v1500_v3 = vmul.f32 %v1498_v62, %v1433_v49 }
0x2474   :  { %v1503_v63 = vpop.permute.xlu1 %1502 }
0x2475   :  { %v1505_v2 = vmul.f32 %v1503_v63, %v1498_v62 }
0x2477   :  { %1507 = vrot.lane.b32.xlu0 %v1505_v2, %s2210_s5 }
0x24e9   :  { %v1508_v6 = vpop.permute.xlu0 %1507 }
0x24ea   :  { %v1510_v5 = vadd.f32 %v1508_v6, %v1500_v3 }
0x24ec   :  { %2200 = vtanh.f32 %v1510_v5 }
0x24f9   :  { %v2201_v9 = vpop.eup %2200 }
0x24fa   :  { %1513 = vrot.lane.b32.xlu1 %v2201_v9, %s2210_s5 }
0x256c   :  { %v1514_v12 = vpop.permute.xlu1 %1513 }
0x256d   :  { %v1516_v13 = vmul.f32 %v1514_v12, %v1498_v62 }
0x256f   :  { %v1517_v17 = vpack.c.bf16 %v1516_v13, %v1516_v13 }
0x2571   :  { %1526 = vrot.lane.b32.xlu0 %v1517_v17, %s2211_s27 }
0x25e3   :  { %v1527_v19 = vpop.permute.xlu0 %1526 }
0x25e4   :  { %2066 = vmatmul.mubr.msk.bf16.vlgmr.msra.gmra.mxu1 %vm97_vm0, %v1527_v19 }
0x26a4   :  { %v1565_v34 = vpop.f32.mrf.mxu1 }
0x26a5   :  { %v1571_v23 = vadd.f32 %v1565_v34, %v956_v20 }
0x26a6   :  { %v2067_v27 = vpop.f32.mrf.mxu1 }
0x26a7   :  { %2202 = vtanh.f32 %v1571_v23  ;;  %v1572_v22 = vmul.f32 0.5, %v1571_v23 }
0x26a8   :  { %v1568_v28 = vpop.f32.mrf.mxu1 }
0x26a9   :  { %2204 = vtanh.f32 %v1572_v22 }
0x26aa   :  { %v2068_v29 = vpop.f32.mrf.mxu1 }
0x26b4   :  { %v2203_v8 = vpop.eup %2202 }
0x26b5   :  { %1579 = vrot.lane.b32.xlu1 %v2203_v8, %s2210_s5 }
0x26b6   :  { %v2205_v14 = vpop.eup %2204 }
0x26b7   :  { %v1574_v30 = vmul.f32 0.5, %v2205_v14 }
0x26b9   :  { %v1575_v25 = vadd.f32 0.5, %v1574_v30 }
0x26bb   :  { %v1577_v10 = vmul.f32 %v1575_v25, %v1510_v5 }
0x2727   :  { %v1580_v31 = vpop.permute.xlu1 %1579 }
0x2728   :  { %v1582_v35 = vmul.f32 %v1580_v31, %v1575_v25 }
0x272a   :  { %1584 = vrot.lane.b32.xlu0 %v1582_v35, %s2210_s5 }
0x272e   :  { %1059 = vrot.lane.b32.xlu0 %v2519_v40, %s2211_s27 }
0x2732   :  { %1213 = vrot.lane.b32.xlu0 %v2585_v45, %s2211_s27  ;;  %v2106_v45 = vld [vmem:[%s2736_s9 + $0x8] sm:$0xff]   ;;  %s2212_s9 = smov 96  }
0x2733   :  { %2069 = vmatprep.subr.bf16.mxu0 %v2106_v45 }
0x2734   :  { %2070 = vmatpush3.bf16.msra.mxu0 %v2106_v45 }
0x2735   :  { %2071 = vmatprep.subr.bf16.mxu0 %v2107_v39 }
0x2736   :  { %1367 = vrot.lane.b32.xlu0 %v2616_v33, %s2211_s27 }
0x2738   :  { %2072 = vmatpush3.bf16.msra.mxu0 %v2107_v39 }
0x273a   :  { %1521 = vrot.lane.b32.xlu0 %v1517_v17, %s2211_s27 }
0x273e   :  { %818 = vrot.lane.b32.xlu0 %v2548_v18, %s2211_s27 }
0x279c   :  { %v1585_v24 = vpop.permute.xlu0 %1584 }
0x279d   :  { %v1587_v36 = vadd.f32 %v1585_v24, %v1577_v10 }
0x279f   :  { %2206 = vtanh.f32 %v1587_v36 }
0x27a0   :  { %v1060_v37 = vpop.permute.xlu0 %1059 }
0x27a1   :  { %1062 = vst.msk [vmem:[#allocation2] sm:$0xf] %vm276_vm2, %v1060_v37 }
0x27a4   :  { %v1214_v38 = vpop.permute.xlu0 %1213 }
0x27a5   :  { %1216 = vst.msk [vmem:[#allocation2 + $0x8] sm:$0xf] %vm276_vm2, %v1214_v38 }
0x27a8   :  { %v1368_v40 = vpop.permute.xlu0 %1367 }
0x27a9   :  { %1370 = vst.msk [vmem:[#allocation2 + $0x10] sm:$0xf] %vm276_vm2, %v1368_v40 }
0x27ac   :  { %v2207_v18 = vpop.eup %2206  ;;  %v1522_v33 = vpop.permute.xlu0 %1521 }
0x27ad   :  { %1524 = vst.msk [vmem:[#allocation2 + $0x18] sm:$0xf] %vm276_vm2, %v1522_v33  ;;  %1590 = vrot.lane.b32.xlu1 %v2207_v18, %s2210_s5 }
0x27b0   :  { %v819_v1 = vpop.permute.xlu0 %818 }
0x27b1   :  { %821 = vst.msk [vmem:[%s2737_s12] sm:$0xff] %vm97_vm0, %v819_v1  ;;  %1136 = vrot.lane.b32.xlu1 %v2555_v16, %s2211_s27 }
0x27b5   :  { %1290 = vrot.lane.b32.xlu1 %v2601_v0, %s2211_s27 }
0x27b9   :  { %1444 = vrot.lane.b32.xlu1 %v2631_v32, %s2211_s27 }
0x281f   :  { %v1591_v41 = vpop.permute.xlu1 %1590 }
0x2820   :  { %v1593_v42 = vmul.f32 %v1591_v41, %v1575_v25 }
0x2822   :  { %v1850_v52 = vpack.c.bf16 %v1593_v42, %v1593_v42  ;;  %1603 = vrot.lane.b32.xlu0 %v1593_v42, %s2211_s27 }
0x2823   :  { %v1137_v43 = vpop.permute.xlu1 %1136 }
0x2824   :  { %1139 = vst.msk [vmem:[#allocation2 + $0x4] sm:$0xf] %vm276_vm2, %v1137_v43  ;;  %1598 = vrot.lane.b32.xlu1 %v1850_v52, %s2211_s27 }
0x2827   :  { %v1291_v44 = vpop.permute.xlu1 %1290 }
0x2828   :  { %1293 = vst.msk [vmem:[#allocation2 + $0xc] sm:$0xf] %vm276_vm2, %v1291_v44  ;;  %823 = vrot.lane.b32.xlu1 %v2529_v48, %s2212_s9 }
0x282b   :  { %v1445_v16 = vpop.permute.xlu1 %1444  ;;  %v2108_v0 = vld [vmem:[#allocation2] sm:$0xff]  }
0x282c   :  { %1447 = vst.msk [vmem:[#allocation2 + $0x14] sm:$0xf] %vm276_vm2, %v1445_v16  ;;  %1609 = vrot.lane.b32.xlu1 %v1587_v36, %s2212_s9  ;;  %2073 = vmatprep.mubr.msk.bf16.mxu0 %vm97_vm0, %v2108_v0 }
0x282f   :  { %v2109_v47 = vld [vmem:[#allocation2 + $0x8] sm:$0xff]  }
0x2830   :  { %2074 = vmatmul.mubr.msk.bf16.vlgmr.msra.gmra.mxu0 %vm97_vm0, %v2109_v47 }
0x2833   :  { %v2110_v7 = vld [vmem:[#allocation2 + $0x10] sm:$0xff]  }
0x2834   :  { %2077 = vmatprep.mubr.msk.bf16.mxu0 %vm97_vm0, %v2110_v7 }
0x2894   :  { %v1604_v15 = vpop.permute.xlu0 %1603 }
0x2895   :  { %1822 = vst.msk [vmem:[%s2737_s12 + $0x8] sm:$0xff] %vm97_vm0, %v1604_v15 }
0x2896   :  { %v1599_v48 = vpop.permute.xlu1 %1598 }
0x2897   :  { %1601 = vst.msk [vmem:[#allocation2 + $0x1c] sm:$0xf] %vm276_vm2, %v1599_v48 }
0x289a   :  { %v824_v60 = vpop.permute.xlu1 %823 }
0x289b   :  { %826 = vst.msk [vmem:[%s2738_s13] sm:$0xff] %vm97_vm0, %v824_v60 }
0x289e   :  { %v1610_v26 = vpop.permute.xlu1 %1609  ;;  %v2111_v49 = vld [vmem:[#allocation2 + $0x18] sm:$0xff]  }
0x289f   :  { %1823 = vst.msk [vmem:[%s2738_s13 + $0x8] sm:$0xff] %vm97_vm0, %v1610_v26  ;;  %2078 = vmatmul.mubr.msk.bf16.gmra.mxu0 %vm97_vm0, %v2111_v49 }
0x28f0   :  { %v2075_v50 = vpop.f32.mrf.mxu0 }
0x28f1   :  { %v1720_v46 = vadd.f32 %v2075_v50, %v1824_v21 }
0x28f2   :  { %v1711_v32 = vpop.f32.mrf.mxu0 }
0x28f3   :  { %1744 = vst [vmem:[%s2740_s11 + $0x10] sm:$0xff] %v1720_v46  ;;  %v1712_v53 = vadd.f32 %v1824_v21, %v1711_v32 }
0x28f4   :  { %v2076_v54 = vpop.f32.mrf.mxu0 }
0x28f5   :  { %1742 = vst [vmem:[%s2740_s11] sm:$0xff] %v1712_v53  ;;  %v1723_v55 = vadd.f32 %v2076_v54, %v1824_v21 }
0x28f6   :  { %v1714_v11 = vpop.f32.mrf.mxu0 }
0x28f7   :  { %1745 = vst [vmem:[%s2740_s11 + $0x18] sm:$0xff] %v1723_v55  ;;  %v1715_v57 = vadd.f32 %v1824_v21, %v1714_v11 }
0x28f9   :  { %1743 = vst [vmem:[%s2740_s11 + $0x8] sm:$0xff] %v1715_v57 }
0x295f   :  { %v2079_v58 = vpop.f32.mrf.mxu0 }
0x2960   :  { %v1736_v56 = vadd.f32 %v2079_v58, %v1824_v21 }
0x2961   :  { %v1727_v59 = vpop.f32.mrf.mxu0 }
0x2962   :  { %1748 = vst [vmem:[%s2740_s11 + $0x30] sm:$0xff] %v1736_v56  ;;  %v1728_v51 = vadd.f32 %v1824_v21, %v1727_v59 }
0x2963   :  { %v2080_v4 = vpop.f32.mrf.mxu0 }
0x2964   :  { %1746 = vst [vmem:[%s2740_s11 + $0x20] sm:$0xff] %v1728_v51  ;;  %v1739_v61 = vadd.f32 %v2080_v4, %v1824_v21 }
0x2965   :  { %v1730_v62 = vpop.f32.mrf.mxu0 }
0x2966   :  { %1749 = vst [vmem:[%s2740_s11 + $0x38] sm:$0xff] %v1739_v61  ;;  %v1731_v63 = vadd.f32 %v1824_v21, %v1730_v62 }
0x2968   :  { %1747 = vst [vmem:[%s2740_s11 + $0x28] sm:$0xff] %v1731_v63 }

</bundles_post_ra>
